<compile_context>
chip_gen: v5e
topology: v5e:2x2
jax: 0.10.0
libtpu: 0.0.40
codegen_flags: <defaults>
</compile_context>

<pallas_src>
import functools

import jax
import jax.numpy as jnp
from jax.experimental import pallas as pl
from jax.experimental.pallas import tpu as pltpu


def _lstm_head_kernel(num_layers, hidden, seq_len, batch, x_ref, *rest):
    """Single-program kernel: full multi-layer LSTM + head, all in VMEM.

    rest = [w_ih_T_0, w_hh_T_0, b_0, ..., w_ih_T_{L-1}, w_hh_T_{L-1}, b_{L-1},
            w_out_T, b_out, out_ref, xproj_scr, hseq_scr, hmax_scr]
    """
    layer_refs = rest[:3 * num_layers]
    w_out_ref = rest[3 * num_layers]
    b_out_ref = rest[3 * num_layers + 1]
    out_ref = rest[3 * num_layers + 2]
    xproj_scr = rest[3 * num_layers + 3]   # (T*B, 4H) VMEM scratch
    hseq_scr = rest[3 * num_layers + 4]    # (T*B, H)  VMEM scratch
    hmax_scr = rest[3 * num_layers + 5]    # (T, H)    VMEM scratch

    H = hidden
    B = batch
    T = seq_len
    last = num_layers - 1

    for l in range(num_layers):
        # Weights loaded once per layer, hoisted out of the recurrence.
        w_ih_T = layer_refs[3 * l][...]      # (D_in, 4H)
        w_hh_T = layer_refs[3 * l + 1][...]  # (H, 4H)
        bias = layer_refs[3 * l + 2][...]    # (1, 4H) = b_ih + b_hh

        # Hoisted input projection: one tall MXU matmul for ALL timesteps.
        inp_seq = x_ref[...] if l == 0 else hseq_scr[...]   # (T*B, D_in)
        xproj_scr[...] = (
            jnp.dot(inp_seq, w_ih_T, preferred_element_type=jnp.float32) + bias
        )

        # Serial recurrence, fully unrolled; only h @ W_hh on the MXU path.
        h = jnp.zeros((B, H), jnp.float32)
        c = jnp.zeros((B, H), jnp.float32)
        for t in range(T):
            gates = xproj_scr[t * B:(t + 1) * B, :] + jnp.dot(
                h, w_hh_T, preferred_element_type=jnp.float32)   # (B, 4H)
            # Full-tile activations (2 EUP pushes), then static lane slices.
            sg = jax.nn.sigmoid(gates)
            tg = jnp.tanh(gates)
            i_g = sg[:, 0 * H:1 * H]   # PyTorch gate order: i, f, g, o
            f_g = sg[:, 1 * H:2 * H]
            g_g = tg[:, 2 * H:3 * H]
            o_g = sg[:, 3 * H:4 * H]
            c = f_g * c + i_g * g_g
            h = o_g * jnp.tanh(c)
            if l < last:
                # Aligned (B, H) store feeding the next layer's projection.
                hseq_scr[t * B:(t + 1) * B, :] = h
            else:
                # Head pooling: max over the (padded) batch for this timestep.
                hmax_scr[t:t + 1, :] = jnp.max(h, axis=0, keepdims=True)

    # Head out of the loop: tanh + linear, one lane-dense store.
    feat = jnp.tanh(hmax_scr[...])                         # (T, H)
    out_ref[...] = (
        jnp.dot(feat, w_out_ref[...], preferred_element_type=jnp.float32)
        + b_out_ref[...]
    )


def lstm_forward(x_tokens, params):
    """Full forward pass. Embedding gather is JAX glue; the rest is in-kernel."""
    emb = params["embedding"][x_tokens].astype(jnp.float32)   # (T, B, D)
    T, B, D = emb.shape
    L = params["num_layers"]
    H = params["hidden"]
    C = params["b_out"].shape[-1]

    # Pad the batch up to a full sublane tile (8) by replicating the last row;
    # the max-over-batch head is unchanged by duplicated rows.
    B_pad = max(8, ((B + 7) // 8) * 8)
    if B_pad != B:
        emb = jnp.pad(emb, ((0, 0), (0, B_pad - B), (0, 0)), mode="edge")
    x_flat = emb.reshape(T * B_pad, D)

    # Lane-dense output: pad the class dim to a full 128-lane vreg; slice back.
    C_pad = ((C + 127) // 128) * 128
    w_out_T = jnp.pad(params["w_out_T"], ((0, 0), (0, C_pad - C)))
    b_out = jnp.pad(params["b_out"], ((0, 0), (0, C_pad - C)))

    inputs = [x_flat]
    for l in range(L):
        inputs += [params[f"w_ih_T_{l}"], params[f"w_hh_T_{l}"], params[f"b_{l}"]]
    inputs += [w_out_T, b_out]

    kernel = functools.partial(_lstm_head_kernel, L, H, T, B_pad)
    out = pl.pallas_call(
        kernel,
        out_shape=jax.ShapeDtypeStruct((T, C_pad), jnp.float32),
        in_specs=[pl.BlockSpec(memory_space=pltpu.MemorySpace.VMEM)] * len(inputs),
        out_specs=pl.BlockSpec(memory_space=pltpu.MemorySpace.VMEM),
        scratch_shapes=[
            pltpu.VMEM((T * B_pad, 4 * H), jnp.float32),   # xproj
            pltpu.VMEM((T * B_pad, H), jnp.float32),       # hidden sequence
            pltpu.VMEM((T, H), jnp.float32),               # per-t batch max
        ],
    )(*inputs)
    return out[:, :C]


def init_params(key, V, D, H, C, L):
    """Deterministic synthetic parameters (shapes match the PyTorch module)."""
    keys = jax.random.split(key, 4 + 4 * L)
    params = {"num_layers": L, "hidden": H}

    # nn.Embedding default init: N(0, 1)
    params["embedding"] = jax.random.normal(keys[0], (V, D), jnp.float32)

    k = 1.0 / jnp.sqrt(H)
    for l in range(L):
        d_in = D if l == 0 else H
        kw = keys[1 + 4 * l: 1 + 4 * (l + 1)]
        if l == 0:
            # xavier_normal_ on layer-0 W_ih / W_hh (gain=1), as in the module
            std_ih = jnp.sqrt(2.0 / (4 * H + d_in))
            std_hh = jnp.sqrt(2.0 / (4 * H + H))
            w_ih = std_ih * jax.random.normal(kw[0], (4 * H, d_in), jnp.float32)
            w_hh = std_hh * jax.random.normal(kw[1], (4 * H, H), jnp.float32)
        else:
            w_ih = jax.random.uniform(kw[0], (4 * H, d_in), jnp.float32, -k, k)
            w_hh = jax.random.uniform(kw[1], (4 * H, H), jnp.float32, -k, k)
        b_ih = jax.random.uniform(kw[2], (4 * H,), jnp.float32, -k, k)
        b_hh = jax.random.uniform(kw[3], (4 * H,), jnp.float32, -k, k)
        # pre-transpose so the kernel does plain (rows, D_in) @ (D_in, 4H) matmuls
        params[f"w_ih_T_{l}"] = w_ih.T
        params[f"w_hh_T_{l}"] = w_hh.T
        params[f"b_{l}"] = (b_ih + b_hh).reshape(1, 4 * H)

    # hidden2label Linear(H, C), PyTorch default uniform init
    w_out = jax.random.uniform(keys[-2], (C, H), jnp.float32, -k, k)
    b_out = jax.random.uniform(keys[-1], (C,), jnp.float32, -k, k)
    params["w_out_T"] = w_out.T
    params["b_out"] = b_out.reshape(1, C)
    return params


if __name__ == "__main__":
    # small, module-consistent shapes
    V, D, H, C, L = 100, 32, 32, 4, 2   # vocab, embed dim, hidden (filter_num), classes, layers
    T, B = 8, 2                         # x is (T=len(x), B) token ids

    key = jax.random.PRNGKey(0)
    k_param, k_x = jax.random.split(key)
    params = init_params(k_param, V, D, H, C, L)
    x = jax.random.randint(k_x, (T, B), 0, V, dtype=jnp.int32)

    logits = lstm_forward(x, params)
    jax.block_until_ready(logits)

    assert logits.shape == (T, C), logits.shape
    assert logits.dtype == jnp.float32
    assert bool(jnp.all(jnp.isfinite(logits)))
    print("KERNEL_OK")
</pallas_src>

<mosaic_0001>
module attributes {stable_mosaic.version = 11 : i64} {
  func.func @_lstm_head_kernel(%arg0: memref<64x32xf32, #tpu.memory_space<vmem>>, %arg1: memref<32x128xf32, #tpu.memory_space<vmem>>, %arg2: memref<32x128xf32, #tpu.memory_space<vmem>>, %arg3: memref<1x128xf32, #tpu.memory_space<vmem>>, %arg4: memref<32x128xf32, #tpu.memory_space<vmem>>, %arg5: memref<32x128xf32, #tpu.memory_space<vmem>>, %arg6: memref<1x128xf32, #tpu.memory_space<vmem>>, %arg7: memref<32x128xf32, #tpu.memory_space<vmem>>, %arg8: memref<1x128xf32, #tpu.memory_space<vmem>>, %arg9: memref<8x128xf32, #tpu.memory_space<vmem>>, %arg10: memref<64x128xf32, #tpu.memory_space<vmem>>, %arg11: memref<64x32xf32, #tpu.memory_space<vmem>>, %arg12: memref<8x32xf32, #tpu.memory_space<vmem>>) attributes {dimension_semantics = [], scalar_prefetch = 0 : i64, scratch_operands = 3 : i64, tpu.core_type = #tpu.core_type<tc>} {
    %c0 = arith.constant 0 : index
    %c0_0 = arith.constant 0 : index
    %0 = vector.load %arg1[%c0, %c0_0] : memref<32x128xf32, #tpu.memory_space<vmem>>, vector<32x128xf32>
    %c0_1 = arith.constant 0 : index
    %c0_2 = arith.constant 0 : index
    %1 = vector.load %arg2[%c0_1, %c0_2] : memref<32x128xf32, #tpu.memory_space<vmem>>, vector<32x128xf32>
    %c0_3 = arith.constant 0 : index
    %c0_4 = arith.constant 0 : index
    %2 = vector.load %arg3[%c0_3, %c0_4] : memref<1x128xf32, #tpu.memory_space<vmem>>, vector<1x128xf32>
    %c0_5 = arith.constant 0 : index
    %c0_6 = arith.constant 0 : index
    %3 = vector.load %arg0[%c0_5, %c0_6] : memref<64x32xf32, #tpu.memory_space<vmem>>, vector<64x32xf32>
    %cst = arith.constant dense<0.000000e+00> : vector<64x128xf32>
    %4 = tpu.matmul %3, %0, %cst {dimension_numbers = #tpu.dot_dimension_numbers<[1], [0], [0], [1], [0, 0, 1, 1], [], []>} : vector<64x32xf32>, vector<32x128xf32>, vector<64x128xf32> -> vector<64x128xf32>
    %5 = vector.broadcast %2 : vector<1x128xf32> to vector<64x128xf32>
    %6 = arith.addf %4, %5 : vector<64x128xf32>
    %c0_7 = arith.constant 0 : index
    %c0_8 = arith.constant 0 : index
    %7 = vector.load %arg10[%c0_7, %c0_8] : memref<64x128xf32, #tpu.memory_space<vmem>>, vector<64x128xf32>
    tpu.vector_store %arg10[%c0_7, %c0_8], %6 {strides = array<i32>} : memref<64x128xf32, #tpu.memory_space<vmem>>, vector<64x128xf32>,
    %cst_9 = arith.constant 0.000000e+00 : f32
    %8 = vector.broadcast %cst_9 : f32 to vector<8x32xf32>
    %cst_10 = arith.constant 0.000000e+00 : f32
    %9 = vector.broadcast %cst_10 : f32 to vector<8x32xf32>
    %c0_11 = arith.constant 0 : index
    %c0_12 = arith.constant 0 : index
    %10 = vector.load %arg10[%c0_11, %c0_12] : memref<64x128xf32, #tpu.memory_space<vmem>>, vector<8x128xf32>
    %cst_13 = arith.constant dense<0.000000e+00> : vector<8x128xf32>
    %11 = tpu.matmul %8, %1, %cst_13 {dimension_numbers = #tpu.dot_dimension_numbers<[1], [0], [0], [1], [0, 0, 1, 1], [], []>} : vector<8x32xf32>, vector<32x128xf32>, vector<8x128xf32> -> vector<8x128xf32>
    %12 = arith.addf %10, %11 : vector<8x128xf32>
    %13 = arith.negf %12 : vector<8x128xf32>
    %14 = math.exp %13 : vector<8x128xf32>
    %cst_14 = arith.constant 1.000000e+00 : f32
    %15 = vector.broadcast %cst_14 : f32 to vector<8x128xf32>
    %16 = arith.addf %15, %14 : vector<8x128xf32>
    %17 = arith.divf %15, %16 : vector<8x128xf32>
    %18 = math.tanh %12 : vector<8x128xf32>
    %19 = vector.extract_strided_slice %17 {offsets = [0, 0], sizes = [8, 32], strides = [1, 1]} : vector<8x128xf32> to vector<8x32xf32>
    %20 = vector.extract_strided_slice %17 {offsets = [0, 32], sizes = [8, 32], strides = [1, 1]} : vector<8x128xf32> to vector<8x32xf32>
    %21 = vector.extract_strided_slice %18 {offsets = [0, 64], sizes = [8, 32], strides = [1, 1]} : vector<8x128xf32> to vector<8x32xf32>
    %22 = vector.extract_strided_slice %17 {offsets = [0, 96], sizes = [8, 32], strides = [1, 1]} : vector<8x128xf32> to vector<8x32xf32>
    %23 = arith.mulf %20, %9 : vector<8x32xf32>
    %24 = arith.mulf %19, %21 : vector<8x32xf32>
    %25 = arith.addf %23, %24 : vector<8x32xf32>
    %26 = math.tanh %25 : vector<8x32xf32>
    %27 = arith.mulf %22, %26 : vector<8x32xf32>
    %c0_15 = arith.constant 0 : index
    %c0_16 = arith.constant 0 : index
    %28 = vector.load %arg11[%c0_15, %c0_16] : memref<64x32xf32, #tpu.memory_space<vmem>>, vector<8x32xf32>
    tpu.vector_store %arg11[%c0_15, %c0_16], %27 {strides = array<i32>} : memref<64x32xf32, #tpu.memory_space<vmem>>, vector<8x32xf32>,
    %c8 = arith.constant 8 : index
    %c0_17 = arith.constant 0 : index
    %29 = vector.load %arg10[%c8, %c0_17] : memref<64x128xf32, #tpu.memory_space<vmem>>, vector<8x128xf32>
    %cst_18 = arith.constant dense<0.000000e+00> : vector<8x128xf32>
    %30 = tpu.matmul %27, %1, %cst_18 {dimension_numbers = #tpu.dot_dimension_numbers<[1], [0], [0], [1], [0, 0, 1, 1], [], []>} : vector<8x32xf32>, vector<32x128xf32>, vector<8x128xf32> -> vector<8x128xf32>
    %31 = arith.addf %29, %30 : vector<8x128xf32>
    %32 = arith.negf %31 : vector<8x128xf32>
    %33 = math.exp %32 : vector<8x128xf32>
    %cst_19 = arith.constant 1.000000e+00 : f32
    %34 = vector.broadcast %cst_19 : f32 to vector<8x128xf32>
    %35 = arith.addf %34, %33 : vector<8x128xf32>
    %36 = arith.divf %34, %35 : vector<8x128xf32>
    %37 = math.tanh %31 : vector<8x128xf32>
    %38 = vector.extract_strided_slice %36 {offsets = [0, 0], sizes = [8, 32], strides = [1, 1]} : vector<8x128xf32> to vector<8x32xf32>
    %39 = vector.extract_strided_slice %36 {offsets = [0, 32], sizes = [8, 32], strides = [1, 1]} : vector<8x128xf32> to vector<8x32xf32>
    %40 = vector.extract_strided_slice %37 {offsets = [0, 64], sizes = [8, 32], strides = [1, 1]} : vector<8x128xf32> to vector<8x32xf32>
    %41 = vector.extract_strided_slice %36 {offsets = [0, 96], sizes = [8, 32], strides = [1, 1]} : vector<8x128xf32> to vector<8x32xf32>
    %42 = arith.mulf %39, %25 : vector<8x32xf32>
    %43 = arith.mulf %38, %40 : vector<8x32xf32>
    %44 = arith.addf %42, %43 : vector<8x32xf32>
    %45 = math.tanh %44 : vector<8x32xf32>
    %46 = arith.mulf %41, %45 : vector<8x32xf32>
    %c8_20 = arith.constant 8 : index
    %c0_21 = arith.constant 0 : index
    %47 = vector.load %arg11[%c8_20, %c0_21] : memref<64x32xf32, #tpu.memory_space<vmem>>, vector<8x32xf32>
    tpu.vector_store %arg11[%c8_20, %c0_21], %46 {strides = array<i32>} : memref<64x32xf32, #tpu.memory_space<vmem>>, vector<8x32xf32>,
    %c16 = arith.constant 16 : index
    %c0_22 = arith.constant 0 : index
    %48 = vector.load %arg10[%c16, %c0_22] : memref<64x128xf32, #tpu.memory_space<vmem>>, vector<8x128xf32>
    %cst_23 = arith.constant dense<0.000000e+00> : vector<8x128xf32>
    %49 = tpu.matmul %46, %1, %cst_23 {dimension_numbers = #tpu.dot_dimension_numbers<[1], [0], [0], [1], [0, 0, 1, 1], [], []>} : vector<8x32xf32>, vector<32x128xf32>, vector<8x128xf32> -> vector<8x128xf32>
    %50 = arith.addf %48, %49 : vector<8x128xf32>
    %51 = arith.negf %50 : vector<8x128xf32>
    %52 = math.exp %51 : vector<8x128xf32>
    %cst_24 = arith.constant 1.000000e+00 : f32
    %53 = vector.broadcast %cst_24 : f32 to vector<8x128xf32>
    %54 = arith.addf %53, %52 : vector<8x128xf32>
    %55 = arith.divf %53, %54 : vector<8x128xf32>
    %56 = math.tanh %50 : vector<8x128xf32>
    %57 = vector.extract_strided_slice %55 {offsets = [0, 0], sizes = [8, 32], strides = [1, 1]} : vector<8x128xf32> to vector<8x32xf32>
    %58 = vector.extract_strided_slice %55 {offsets = [0, 32], sizes = [8, 32], strides = [1, 1]} : vector<8x128xf32> to vector<8x32xf32>
    %59 = vector.extract_strided_slice %56 {offsets = [0, 64], sizes = [8, 32], strides = [1, 1]} : vector<8x128xf32> to vector<8x32xf32>
    %60 = vector.extract_strided_slice %55 {offsets = [0, 96], sizes = [8, 32], strides = [1, 1]} : vector<8x128xf32> to vector<8x32xf32>
    %61 = arith.mulf %58, %44 : vector<8x32xf32>
    %62 = arith.mulf %57, %59 : vector<8x32xf32>
    %63 = arith.addf %61, %62 : vector<8x32xf32>
    %64 = math.tanh %63 : vector<8x32xf32>
    %65 = arith.mulf %60, %64 : vector<8x32xf32>
    %c16_25 = arith.constant 16 : index
    %c0_26 = arith.constant 0 : index
    %66 = vector.load %arg11[%c16_25, %c0_26] : memref<64x32xf32, #tpu.memory_space<vmem>>, vector<8x32xf32>
    tpu.vector_store %arg11[%c16_25, %c0_26], %65 {strides = array<i32>} : memref<64x32xf32, #tpu.memory_space<vmem>>, vector<8x32xf32>,
    %c24 = arith.constant 24 : index
    %c0_27 = arith.constant 0 : index
    %67 = vector.load %arg10[%c24, %c0_27] : memref<64x128xf32, #tpu.memory_space<vmem>>, vector<8x128xf32>
    %cst_28 = arith.constant dense<0.000000e+00> : vector<8x128xf32>
    %68 = tpu.matmul %65, %1, %cst_28 {dimension_numbers = #tpu.dot_dimension_numbers<[1], [0], [0], [1], [0, 0, 1, 1], [], []>} : vector<8x32xf32>, vector<32x128xf32>, vector<8x128xf32> -> vector<8x128xf32>
    %69 = arith.addf %67, %68 : vector<8x128xf32>
    %70 = arith.negf %69 : vector<8x128xf32>
    %71 = math.exp %70 : vector<8x128xf32>
    %cst_29 = arith.constant 1.000000e+00 : f32
    %72 = vector.broadcast %cst_29 : f32 to vector<8x128xf32>
    %73 = arith.addf %72, %71 : vector<8x128xf32>
    %74 = arith.divf %72, %73 : vector<8x128xf32>
    %75 = math.tanh %69 : vector<8x128xf32>
    %76 = vector.extract_strided_slice %74 {offsets = [0, 0], sizes = [8, 32], strides = [1, 1]} : vector<8x128xf32> to vector<8x32xf32>
    %77 = vector.extract_strided_slice %74 {offsets = [0, 32], sizes = [8, 32], strides = [1, 1]} : vector<8x128xf32> to vector<8x32xf32>
    %78 = vector.extract_strided_slice %75 {offsets = [0, 64], sizes = [8, 32], strides = [1, 1]} : vector<8x128xf32> to vector<8x32xf32>
    %79 = vector.extract_strided_slice %74 {offsets = [0, 96], sizes = [8, 32], strides = [1, 1]} : vector<8x128xf32> to vector<8x32xf32>
    %80 = arith.mulf %77, %63 : vector<8x32xf32>
    %81 = arith.mulf %76, %78 : vector<8x32xf32>
    %82 = arith.addf %80, %81 : vector<8x32xf32>
    %83 = math.tanh %82 : vector<8x32xf32>
    %84 = arith.mulf %79, %83 : vector<8x32xf32>
    %c24_30 = arith.constant 24 : index
    %c0_31 = arith.constant 0 : index
    %85 = vector.load %arg11[%c24_30, %c0_31] : memref<64x32xf32, #tpu.memory_space<vmem>>, vector<8x32xf32>
    tpu.vector_store %arg11[%c24_30, %c0_31], %84 {strides = array<i32>} : memref<64x32xf32, #tpu.memory_space<vmem>>, vector<8x32xf32>,
    %c32 = arith.constant 32 : index
    %c0_32 = arith.constant 0 : index
    %86 = vector.load %arg10[%c32, %c0_32] : memref<64x128xf32, #tpu.memory_space<vmem>>, vector<8x128xf32>
    %cst_33 = arith.constant dense<0.000000e+00> : vector<8x128xf32>
    %87 = tpu.matmul %84, %1, %cst_33 {dimension_numbers = #tpu.dot_dimension_numbers<[1], [0], [0], [1], [0, 0, 1, 1], [], []>} : vector<8x32xf32>, vector<32x128xf32>, vector<8x128xf32> -> vector<8x128xf32>
    %88 = arith.addf %86, %87 : vector<8x128xf32>
    %89 = arith.negf %88 : vector<8x128xf32>
    %90 = math.exp %89 : vector<8x128xf32>
    %cst_34 = arith.constant 1.000000e+00 : f32
    %91 = vector.broadcast %cst_34 : f32 to vector<8x128xf32>
    %92 = arith.addf %91, %90 : vector<8x128xf32>
    %93 = arith.divf %91, %92 : vector<8x128xf32>
    %94 = math.tanh %88 : vector<8x128xf32>
    %95 = vector.extract_strided_slice %93 {offsets = [0, 0], sizes = [8, 32], strides = [1, 1]} : vector<8x128xf32> to vector<8x32xf32>
    %96 = vector.extract_strided_slice %93 {offsets = [0, 32], sizes = [8, 32], strides = [1, 1]} : vector<8x128xf32> to vector<8x32xf32>
    %97 = vector.extract_strided_slice %94 {offsets = [0, 64], sizes = [8, 32], strides = [1, 1]} : vector<8x128xf32> to vector<8x32xf32>
    %98 = vector.extract_strided_slice %93 {offsets = [0, 96], sizes = [8, 32], strides = [1, 1]} : vector<8x128xf32> to vector<8x32xf32>
    %99 = arith.mulf %96, %82 : vector<8x32xf32>
    %100 = arith.mulf %95, %97 : vector<8x32xf32>
    %101 = arith.addf %99, %100 : vector<8x32xf32>
    %102 = math.tanh %101 : vector<8x32xf32>
    %103 = arith.mulf %98, %102 : vector<8x32xf32>
    %c32_35 = arith.constant 32 : index
    %c0_36 = arith.constant 0 : index
    %104 = vector.load %arg11[%c32_35, %c0_36] : memref<64x32xf32, #tpu.memory_space<vmem>>, vector<8x32xf32>
    tpu.vector_store %arg11[%c32_35, %c0_36], %103 {strides = array<i32>} : memref<64x32xf32, #tpu.memory_space<vmem>>, vector<8x32xf32>,
    %c40 = arith.constant 40 : index
    %c0_37 = arith.constant 0 : index
    %105 = vector.load %arg10[%c40, %c0_37] : memref<64x128xf32, #tpu.memory_space<vmem>>, vector<8x128xf32>
    %cst_38 = arith.constant dense<0.000000e+00> : vector<8x128xf32>
    %106 = tpu.matmul %103, %1, %cst_38 {dimension_numbers = #tpu.dot_dimension_numbers<[1], [0], [0], [1], [0, 0, 1, 1], [], []>} : vector<8x32xf32>, vector<32x128xf32>, vector<8x128xf32> -> vector<8x128xf32>
    %107 = arith.addf %105, %106 : vector<8x128xf32>
    %108 = arith.negf %107 : vector<8x128xf32>
    %109 = math.exp %108 : vector<8x128xf32>
    %cst_39 = arith.constant 1.000000e+00 : f32
    %110 = vector.broadcast %cst_39 : f32 to vector<8x128xf32>
    %111 = arith.addf %110, %109 : vector<8x128xf32>
    %112 = arith.divf %110, %111 : vector<8x128xf32>
    %113 = math.tanh %107 : vector<8x128xf32>
    %114 = vector.extract_strided_slice %112 {offsets = [0, 0], sizes = [8, 32], strides = [1, 1]} : vector<8x128xf32> to vector<8x32xf32>
    %115 = vector.extract_strided_slice %112 {offsets = [0, 32], sizes = [8, 32], strides = [1, 1]} : vector<8x128xf32> to vector<8x32xf32>
    %116 = vector.extract_strided_slice %113 {offsets = [0, 64], sizes = [8, 32], strides = [1, 1]} : vector<8x128xf32> to vector<8x32xf32>
    %117 = vector.extract_strided_slice %112 {offsets = [0, 96], sizes = [8, 32], strides = [1, 1]} : vector<8x128xf32> to vector<8x32xf32>
    %118 = arith.mulf %115, %101 : vector<8x32xf32>
    %119 = arith.mulf %114, %116 : vector<8x32xf32>
    %120 = arith.addf %118, %119 : vector<8x32xf32>
    %121 = math.tanh %120 : vector<8x32xf32>
    %122 = arith.mulf %117, %121 : vector<8x32xf32>
    %c40_40 = arith.constant 40 : index
    %c0_41 = arith.constant 0 : index
    %123 = vector.load %arg11[%c40_40, %c0_41] : memref<64x32xf32, #tpu.memory_space<vmem>>, vector<8x32xf32>
    tpu.vector_store %arg11[%c40_40, %c0_41], %122 {strides = array<i32>} : memref<64x32xf32, #tpu.memory_space<vmem>>, vector<8x32xf32>,
    %c48 = arith.constant 48 : index
    %c0_42 = arith.constant 0 : index
    %124 = vector.load %arg10[%c48, %c0_42] : memref<64x128xf32, #tpu.memory_space<vmem>>, vector<8x128xf32>
    %cst_43 = arith.constant dense<0.000000e+00> : vector<8x128xf32>
    %125 = tpu.matmul %122, %1, %cst_43 {dimension_numbers = #tpu.dot_dimension_numbers<[1], [0], [0], [1], [0, 0, 1, 1], [], []>} : vector<8x32xf32>, vector<32x128xf32>, vector<8x128xf32> -> vector<8x128xf32>
    %126 = arith.addf %124, %125 : vector<8x128xf32>
    %127 = arith.negf %126 : vector<8x128xf32>
    %128 = math.exp %127 : vector<8x128xf32>
    %cst_44 = arith.constant 1.000000e+00 : f32
    %129 = vector.broadcast %cst_44 : f32 to vector<8x128xf32>
    %130 = arith.addf %129, %128 : vector<8x128xf32>
    %131 = arith.divf %129, %130 : vector<8x128xf32>
    %132 = math.tanh %126 : vector<8x128xf32>
    %133 = vector.extract_strided_slice %131 {offsets = [0, 0], sizes = [8, 32], strides = [1, 1]} : vector<8x128xf32> to vector<8x32xf32>
    %134 = vector.extract_strided_slice %131 {offsets = [0, 32], sizes = [8, 32], strides = [1, 1]} : vector<8x128xf32> to vector<8x32xf32>
    %135 = vector.extract_strided_slice %132 {offsets = [0, 64], sizes = [8, 32], strides = [1, 1]} : vector<8x128xf32> to vector<8x32xf32>
    %136 = vector.extract_strided_slice %131 {offsets = [0, 96], sizes = [8, 32], strides = [1, 1]} : vector<8x128xf32> to vector<8x32xf32>
    %137 = arith.mulf %134, %120 : vector<8x32xf32>
    %138 = arith.mulf %133, %135 : vector<8x32xf32>
    %139 = arith.addf %137, %138 : vector<8x32xf32>
    %140 = math.tanh %139 : vector<8x32xf32>
    %141 = arith.mulf %136, %140 : vector<8x32xf32>
    %c48_45 = arith.constant 48 : index
    %c0_46 = arith.constant 0 : index
    %142 = vector.load %arg11[%c48_45, %c0_46] : memref<64x32xf32, #tpu.memory_space<vmem>>, vector<8x32xf32>
    tpu.vector_store %arg11[%c48_45, %c0_46], %141 {strides = array<i32>} : memref<64x32xf32, #tpu.memory_space<vmem>>, vector<8x32xf32>,
    %c56 = arith.constant 56 : index
    %c0_47 = arith.constant 0 : index
    %143 = vector.load %arg10[%c56, %c0_47] : memref<64x128xf32, #tpu.memory_space<vmem>>, vector<8x128xf32>
    %cst_48 = arith.constant dense<0.000000e+00> : vector<8x128xf32>
    %144 = tpu.matmul %141, %1, %cst_48 {dimension_numbers = #tpu.dot_dimension_numbers<[1], [0], [0], [1], [0, 0, 1, 1], [], []>} : vector<8x32xf32>, vector<32x128xf32>, vector<8x128xf32> -> vector<8x128xf32>
    %145 = arith.addf %143, %144 : vector<8x128xf32>
    %146 = arith.negf %145 : vector<8x128xf32>
    %147 = math.exp %146 : vector<8x128xf32>
    %cst_49 = arith.constant 1.000000e+00 : f32
    %148 = vector.broadcast %cst_49 : f32 to vector<8x128xf32>
    %149 = arith.addf %148, %147 : vector<8x128xf32>
    %150 = arith.divf %148, %149 : vector<8x128xf32>
    %151 = math.tanh %145 : vector<8x128xf32>
    %152 = vector.extract_strided_slice %150 {offsets = [0, 0], sizes = [8, 32], strides = [1, 1]} : vector<8x128xf32> to vector<8x32xf32>
    %153 = vector.extract_strided_slice %150 {offsets = [0, 32], sizes = [8, 32], strides = [1, 1]} : vector<8x128xf32> to vector<8x32xf32>
    %154 = vector.extract_strided_slice %151 {offsets = [0, 64], sizes = [8, 32], strides = [1, 1]} : vector<8x128xf32> to vector<8x32xf32>
    %155 = vector.extract_strided_slice %150 {offsets = [0, 96], sizes = [8, 32], strides = [1, 1]} : vector<8x128xf32> to vector<8x32xf32>
    %156 = arith.mulf %153, %139 : vector<8x32xf32>
    %157 = arith.mulf %152, %154 : vector<8x32xf32>
    %158 = arith.addf %156, %157 : vector<8x32xf32>
    %159 = math.tanh %158 : vector<8x32xf32>
    %160 = arith.mulf %155, %159 : vector<8x32xf32>
    %c56_50 = arith.constant 56 : index
    %c0_51 = arith.constant 0 : index
    %161 = vector.load %arg11[%c56_50, %c0_51] : memref<64x32xf32, #tpu.memory_space<vmem>>, vector<8x32xf32>
    tpu.vector_store %arg11[%c56_50, %c0_51], %160 {strides = array<i32>} : memref<64x32xf32, #tpu.memory_space<vmem>>, vector<8x32xf32>,
    %c0_52 = arith.constant 0 : index
    %c0_53 = arith.constant 0 : index
    %162 = vector.load %arg4[%c0_52, %c0_53] : memref<32x128xf32, #tpu.memory_space<vmem>>, vector<32x128xf32>
    %c0_54 = arith.constant 0 : index
    %c0_55 = arith.constant 0 : index
    %163 = vector.load %arg5[%c0_54, %c0_55] : memref<32x128xf32, #tpu.memory_space<vmem>>, vector<32x128xf32>
    %c0_56 = arith.constant 0 : index
    %c0_57 = arith.constant 0 : index
    %164 = vector.load %arg6[%c0_56, %c0_57] : memref<1x128xf32, #tpu.memory_space<vmem>>, vector<1x128xf32>
    %c0_58 = arith.constant 0 : index
    %c0_59 = arith.constant 0 : index
    %165 = vector.load %arg11[%c0_58, %c0_59] : memref<64x32xf32, #tpu.memory_space<vmem>>, vector<64x32xf32>
    %cst_60 = arith.constant dense<0.000000e+00> : vector<64x128xf32>
    %166 = tpu.matmul %165, %162, %cst_60 {dimension_numbers = #tpu.dot_dimension_numbers<[1], [0], [0], [1], [0, 0, 1, 1], [], []>} : vector<64x32xf32>, vector<32x128xf32>, vector<64x128xf32> -> vector<64x128xf32>
    %167 = vector.broadcast %164 : vector<1x128xf32> to vector<64x128xf32>
    %168 = arith.addf %166, %167 : vector<64x128xf32>
    %c0_61 = arith.constant 0 : index
    %c0_62 = arith.constant 0 : index
    %169 = vector.load %arg10[%c0_61, %c0_62] : memref<64x128xf32, #tpu.memory_space<vmem>>, vector<64x128xf32>
    tpu.vector_store %arg10[%c0_61, %c0_62], %168 {strides = array<i32>} : memref<64x128xf32, #tpu.memory_space<vmem>>, vector<64x128xf32>,
    %cst_63 = arith.constant 0.000000e+00 : f32
    %170 = vector.broadcast %cst_63 : f32 to vector<8x32xf32>
    %cst_64 = arith.constant 0.000000e+00 : f32
    %171 = vector.broadcast %cst_64 : f32 to vector<8x32xf32>
    %c0_65 = arith.constant 0 : index
    %c0_66 = arith.constant 0 : index
    %172 = vector.load %arg10[%c0_65, %c0_66] : memref<64x128xf32, #tpu.memory_space<vmem>>, vector<8x128xf32>
    %cst_67 = arith.constant dense<0.000000e+00> : vector<8x128xf32>
    %173 = tpu.matmul %170, %163, %cst_67 {dimension_numbers = #tpu.dot_dimension_numbers<[1], [0], [0], [1], [0, 0, 1, 1], [], []>} : vector<8x32xf32>, vector<32x128xf32>, vector<8x128xf32> -> vector<8x128xf32>
    %174 = arith.addf %172, %173 : vector<8x128xf32>
    %175 = arith.negf %174 : vector<8x128xf32>
    %176 = math.exp %175 : vector<8x128xf32>
    %cst_68 = arith.constant 1.000000e+00 : f32
    %177 = vector.broadcast %cst_68 : f32 to vector<8x128xf32>
    %178 = arith.addf %177, %176 : vector<8x128xf32>
    %179 = arith.divf %177, %178 : vector<8x128xf32>
    %180 = math.tanh %174 : vector<8x128xf32>
    %181 = vector.extract_strided_slice %179 {offsets = [0, 0], sizes = [8, 32], strides = [1, 1]} : vector<8x128xf32> to vector<8x32xf32>
    %182 = vector.extract_strided_slice %179 {offsets = [0, 32], sizes = [8, 32], strides = [1, 1]} : vector<8x128xf32> to vector<8x32xf32>
    %183 = vector.extract_strided_slice %180 {offsets = [0, 64], sizes = [8, 32], strides = [1, 1]} : vector<8x128xf32> to vector<8x32xf32>
    %184 = vector.extract_strided_slice %179 {offsets = [0, 96], sizes = [8, 32], strides = [1, 1]} : vector<8x128xf32> to vector<8x32xf32>
    %185 = arith.mulf %182, %171 : vector<8x32xf32>
    %186 = arith.mulf %181, %183 : vector<8x32xf32>
    %187 = arith.addf %185, %186 : vector<8x32xf32>
    %188 = math.tanh %187 : vector<8x32xf32>
    %189 = arith.mulf %184, %188 : vector<8x32xf32>
    %cst_69 = arith.constant dense<0xFF800000> : vector<32xf32>
    %190 = vector.multi_reduction <maximumf>, %189, %cst_69 [0] : vector<8x32xf32> to vector<32xf32>
    %191 = vector.shape_cast %190 : vector<32xf32> to vector<1x32xf32>
    %c0_70 = arith.constant 0 : index
    %c0_71 = arith.constant 0 : index
    %192 = vector.load %arg12[%c0_70, %c0_71] : memref<8x32xf32, #tpu.memory_space<vmem>>, vector<1x32xf32>
    tpu.vector_store %arg12[%c0_70, %c0_71], %191 {strides = array<i32>} : memref<8x32xf32, #tpu.memory_space<vmem>>, vector<1x32xf32>,
    %c8_72 = arith.constant 8 : index
    %c0_73 = arith.constant 0 : index
    %193 = vector.load %arg10[%c8_72, %c0_73] : memref<64x128xf32, #tpu.memory_space<vmem>>, vector<8x128xf32>
    %cst_74 = arith.constant dense<0.000000e+00> : vector<8x128xf32>
    %194 = tpu.matmul %189, %163, %cst_74 {dimension_numbers = #tpu.dot_dimension_numbers<[1], [0], [0], [1], [0, 0, 1, 1], [], []>} : vector<8x32xf32>, vector<32x128xf32>, vector<8x128xf32> -> vector<8x128xf32>
    %195 = arith.addf %193, %194 : vector<8x128xf32>
    %196 = arith.negf %195 : vector<8x128xf32>
    %197 = math.exp %196 : vector<8x128xf32>
    %cst_75 = arith.constant 1.000000e+00 : f32
    %198 = vector.broadcast %cst_75 : f32 to vector<8x128xf32>
    %199 = arith.addf %198, %197 : vector<8x128xf32>
    %200 = arith.divf %198, %199 : vector<8x128xf32>
    %201 = math.tanh %195 : vector<8x128xf32>
    %202 = vector.extract_strided_slice %200 {offsets = [0, 0], sizes = [8, 32], strides = [1, 1]} : vector<8x128xf32> to vector<8x32xf32>
    %203 = vector.extract_strided_slice %200 {offsets = [0, 32], sizes = [8, 32], strides = [1, 1]} : vector<8x128xf32> to vector<8x32xf32>
    %204 = vector.extract_strided_slice %201 {offsets = [0, 64], sizes = [8, 32], strides = [1, 1]} : vector<8x128xf32> to vector<8x32xf32>
    %205 = vector.extract_strided_slice %200 {offsets = [0, 96], sizes = [8, 32], strides = [1, 1]} : vector<8x128xf32> to vector<8x32xf32>
    %206 = arith.mulf %203, %187 : vector<8x32xf32>
    %207 = arith.mulf %202, %204 : vector<8x32xf32>
    %208 = arith.addf %206, %207 : vector<8x32xf32>
    %209 = math.tanh %208 : vector<8x32xf32>
    %210 = arith.mulf %205, %209 : vector<8x32xf32>
    %cst_76 = arith.constant dense<0xFF800000> : vector<32xf32>
    %211 = vector.multi_reduction <maximumf>, %210, %cst_76 [0] : vector<8x32xf32> to vector<32xf32>
    %212 = vector.shape_cast %211 : vector<32xf32> to vector<1x32xf32>
    %c1 = arith.constant 1 : index
    %c0_77 = arith.constant 0 : index
    %213 = vector.load %arg12[%c1, %c0_77] : memref<8x32xf32, #tpu.memory_space<vmem>>, vector<1x32xf32>
    tpu.vector_store %arg12[%c1, %c0_77], %212 {strides = array<i32>} : memref<8x32xf32, #tpu.memory_space<vmem>>, vector<1x32xf32>,
    %c16_78 = arith.constant 16 : index
    %c0_79 = arith.constant 0 : index
    %214 = vector.load %arg10[%c16_78, %c0_79] : memref<64x128xf32, #tpu.memory_space<vmem>>, vector<8x128xf32>
    %cst_80 = arith.constant dense<0.000000e+00> : vector<8x128xf32>
    %215 = tpu.matmul %210, %163, %cst_80 {dimension_numbers = #tpu.dot_dimension_numbers<[1], [0], [0], [1], [0, 0, 1, 1], [], []>} : vector<8x32xf32>, vector<32x128xf32>, vector<8x128xf32> -> vector<8x128xf32>
    %216 = arith.addf %214, %215 : vector<8x128xf32>
    %217 = arith.negf %216 : vector<8x128xf32>
    %218 = math.exp %217 : vector<8x128xf32>
    %cst_81 = arith.constant 1.000000e+00 : f32
    %219 = vector.broadcast %cst_81 : f32 to vector<8x128xf32>
    %220 = arith.addf %219, %218 : vector<8x128xf32>
    %221 = arith.divf %219, %220 : vector<8x128xf32>
    %222 = math.tanh %216 : vector<8x128xf32>
    %223 = vector.extract_strided_slice %221 {offsets = [0, 0], sizes = [8, 32], strides = [1, 1]} : vector<8x128xf32> to vector<8x32xf32>
    %224 = vector.extract_strided_slice %221 {offsets = [0, 32], sizes = [8, 32], strides = [1, 1]} : vector<8x128xf32> to vector<8x32xf32>
    %225 = vector.extract_strided_slice %222 {offsets = [0, 64], sizes = [8, 32], strides = [1, 1]} : vector<8x128xf32> to vector<8x32xf32>
    %226 = vector.extract_strided_slice %221 {offsets = [0, 96], sizes = [8, 32], strides = [1, 1]} : vector<8x128xf32> to vector<8x32xf32>
    %227 = arith.mulf %224, %208 : vector<8x32xf32>
    %228 = arith.mulf %223, %225 : vector<8x32xf32>
    %229 = arith.addf %227, %228 : vector<8x32xf32>
    %230 = math.tanh %229 : vector<8x32xf32>
    %231 = arith.mulf %226, %230 : vector<8x32xf32>
    %cst_82 = arith.constant dense<0xFF800000> : vector<32xf32>
    %232 = vector.multi_reduction <maximumf>, %231, %cst_82 [0] : vector<8x32xf32> to vector<32xf32>
    %233 = vector.shape_cast %232 : vector<32xf32> to vector<1x32xf32>
    %c2 = arith.constant 2 : index
    %c0_83 = arith.constant 0 : index
    %234 = vector.load %arg12[%c2, %c0_83] : memref<8x32xf32, #tpu.memory_space<vmem>>, vector<1x32xf32>
    tpu.vector_store %arg12[%c2, %c0_83], %233 {strides = array<i32>} : memref<8x32xf32, #tpu.memory_space<vmem>>, vector<1x32xf32>,
    %c24_84 = arith.constant 24 : index
    %c0_85 = arith.constant 0 : index
    %235 = vector.load %arg10[%c24_84, %c0_85] : memref<64x128xf32, #tpu.memory_space<vmem>>, vector<8x128xf32>
    %cst_86 = arith.constant dense<0.000000e+00> : vector<8x128xf32>
    %236 = tpu.matmul %231, %163, %cst_86 {dimension_numbers = #tpu.dot_dimension_numbers<[1], [0], [0], [1], [0, 0, 1, 1], [], []>} : vector<8x32xf32>, vector<32x128xf32>, vector<8x128xf32> -> vector<8x128xf32>
    %237 = arith.addf %235, %236 : vector<8x128xf32>
    %238 = arith.negf %237 : vector<8x128xf32>
    %239 = math.exp %238 : vector<8x128xf32>
    %cst_87 = arith.constant 1.000000e+00 : f32
    %240 = vector.broadcast %cst_87 : f32 to vector<8x128xf32>
    %241 = arith.addf %240, %239 : vector<8x128xf32>
    %242 = arith.divf %240, %241 : vector<8x128xf32>
    %243 = math.tanh %237 : vector<8x128xf32>
    %244 = vector.extract_strided_slice %242 {offsets = [0, 0], sizes = [8, 32], strides = [1, 1]} : vector<8x128xf32> to vector<8x32xf32>
    %245 = vector.extract_strided_slice %242 {offsets = [0, 32], sizes = [8, 32], strides = [1, 1]} : vector<8x128xf32> to vector<8x32xf32>
    %246 = vector.extract_strided_slice %243 {offsets = [0, 64], sizes = [8, 32], strides = [1, 1]} : vector<8x128xf32> to vector<8x32xf32>
    %247 = vector.extract_strided_slice %242 {offsets = [0, 96], sizes = [8, 32], strides = [1, 1]} : vector<8x128xf32> to vector<8x32xf32>
    %248 = arith.mulf %245, %229 : vector<8x32xf32>
    %249 = arith.mulf %244, %246 : vector<8x32xf32>
    %250 = arith.addf %248, %249 : vector<8x32xf32>
    %251 = math.tanh %250 : vector<8x32xf32>
    %252 = arith.mulf %247, %251 : vector<8x32xf32>
    %cst_88 = arith.constant dense<0xFF800000> : vector<32xf32>
    %253 = vector.multi_reduction <maximumf>, %252, %cst_88 [0] : vector<8x32xf32> to vector<32xf32>
    %254 = vector.shape_cast %253 : vector<32xf32> to vector<1x32xf32>
    %c3 = arith.constant 3 : index
    %c0_89 = arith.constant 0 : index
    %255 = vector.load %arg12[%c3, %c0_89] : memref<8x32xf32, #tpu.memory_space<vmem>>, vector<1x32xf32>
    tpu.vector_store %arg12[%c3, %c0_89], %254 {strides = array<i32>} : memref<8x32xf32, #tpu.memory_space<vmem>>, vector<1x32xf32>,
    %c32_90 = arith.constant 32 : index
    %c0_91 = arith.constant 0 : index
    %256 = vector.load %arg10[%c32_90, %c0_91] : memref<64x128xf32, #tpu.memory_space<vmem>>, vector<8x128xf32>
    %cst_92 = arith.constant dense<0.000000e+00> : vector<8x128xf32>
    %257 = tpu.matmul %252, %163, %cst_92 {dimension_numbers = #tpu.dot_dimension_numbers<[1], [0], [0], [1], [0, 0, 1, 1], [], []>} : vector<8x32xf32>, vector<32x128xf32>, vector<8x128xf32> -> vector<8x128xf32>
    %258 = arith.addf %256, %257 : vector<8x128xf32>
    %259 = arith.negf %258 : vector<8x128xf32>
    %260 = math.exp %259 : vector<8x128xf32>
    %cst_93 = arith.constant 1.000000e+00 : f32
    %261 = vector.broadcast %cst_93 : f32 to vector<8x128xf32>
    %262 = arith.addf %261, %260 : vector<8x128xf32>
    %263 = arith.divf %261, %262 : vector<8x128xf32>
    %264 = math.tanh %258 : vector<8x128xf32>
    %265 = vector.extract_strided_slice %263 {offsets = [0, 0], sizes = [8, 32], strides = [1, 1]} : vector<8x128xf32> to vector<8x32xf32>
    %266 = vector.extract_strided_slice %263 {offsets = [0, 32], sizes = [8, 32], strides = [1, 1]} : vector<8x128xf32> to vector<8x32xf32>
    %267 = vector.extract_strided_slice %264 {offsets = [0, 64], sizes = [8, 32], strides = [1, 1]} : vector<8x128xf32> to vector<8x32xf32>
    %268 = vector.extract_strided_slice %263 {offsets = [0, 96], sizes = [8, 32], strides = [1, 1]} : vector<8x128xf32> to vector<8x32xf32>
    %269 = arith.mulf %266, %250 : vector<8x32xf32>
    %270 = arith.mulf %265, %267 : vector<8x32xf32>
    %271 = arith.addf %269, %270 : vector<8x32xf32>
    %272 = math.tanh %271 : vector<8x32xf32>
    %273 = arith.mulf %268, %272 : vector<8x32xf32>
    %cst_94 = arith.constant dense<0xFF800000> : vector<32xf32>
    %274 = vector.multi_reduction <maximumf>, %273, %cst_94 [0] : vector<8x32xf32> to vector<32xf32>
    %275 = vector.shape_cast %274 : vector<32xf32> to vector<1x32xf32>
    %c4 = arith.constant 4 : index
    %c0_95 = arith.constant 0 : index
    %276 = vector.load %arg12[%c4, %c0_95] : memref<8x32xf32, #tpu.memory_space<vmem>>, vector<1x32xf32>
    tpu.vector_store %arg12[%c4, %c0_95], %275 {strides = array<i32>} : memref<8x32xf32, #tpu.memory_space<vmem>>, vector<1x32xf32>,
    %c40_96 = arith.constant 40 : index
    %c0_97 = arith.constant 0 : index
    %277 = vector.load %arg10[%c40_96, %c0_97] : memref<64x128xf32, #tpu.memory_space<vmem>>, vector<8x128xf32>
    %cst_98 = arith.constant dense<0.000000e+00> : vector<8x128xf32>
    %278 = tpu.matmul %273, %163, %cst_98 {dimension_numbers = #tpu.dot_dimension_numbers<[1], [0], [0], [1], [0, 0, 1, 1], [], []>} : vector<8x32xf32>, vector<32x128xf32>, vector<8x128xf32> -> vector<8x128xf32>
    %279 = arith.addf %277, %278 : vector<8x128xf32>
    %280 = arith.negf %279 : vector<8x128xf32>
    %281 = math.exp %280 : vector<8x128xf32>
    %cst_99 = arith.constant 1.000000e+00 : f32
    %282 = vector.broadcast %cst_99 : f32 to vector<8x128xf32>
    %283 = arith.addf %282, %281 : vector<8x128xf32>
    %284 = arith.divf %282, %283 : vector<8x128xf32>
    %285 = math.tanh %279 : vector<8x128xf32>
    %286 = vector.extract_strided_slice %284 {offsets = [0, 0], sizes = [8, 32], strides = [1, 1]} : vector<8x128xf32> to vector<8x32xf32>
    %287 = vector.extract_strided_slice %284 {offsets = [0, 32], sizes = [8, 32], strides = [1, 1]} : vector<8x128xf32> to vector<8x32xf32>
    %288 = vector.extract_strided_slice %285 {offsets = [0, 64], sizes = [8, 32], strides = [1, 1]} : vector<8x128xf32> to vector<8x32xf32>
    %289 = vector.extract_strided_slice %284 {offsets = [0, 96], sizes = [8, 32], strides = [1, 1]} : vector<8x128xf32> to vector<8x32xf32>
    %290 = arith.mulf %287, %271 : vector<8x32xf32>
    %291 = arith.mulf %286, %288 : vector<8x32xf32>
    %292 = arith.addf %290, %291 : vector<8x32xf32>
    %293 = math.tanh %292 : vector<8x32xf32>
    %294 = arith.mulf %289, %293 : vector<8x32xf32>
    %cst_100 = arith.constant dense<0xFF800000> : vector<32xf32>
    %295 = vector.multi_reduction <maximumf>, %294, %cst_100 [0] : vector<8x32xf32> to vector<32xf32>
    %296 = vector.shape_cast %295 : vector<32xf32> to vector<1x32xf32>
    %c5 = arith.constant 5 : index
    %c0_101 = arith.constant 0 : index
    %297 = vector.load %arg12[%c5, %c0_101] : memref<8x32xf32, #tpu.memory_space<vmem>>, vector<1x32xf32>
    tpu.vector_store %arg12[%c5, %c0_101], %296 {strides = array<i32>} : memref<8x32xf32, #tpu.memory_space<vmem>>, vector<1x32xf32>,
    %c48_102 = arith.constant 48 : index
    %c0_103 = arith.constant 0 : index
    %298 = vector.load %arg10[%c48_102, %c0_103] : memref<64x128xf32, #tpu.memory_space<vmem>>, vector<8x128xf32>
    %cst_104 = arith.constant dense<0.000000e+00> : vector<8x128xf32>
    %299 = tpu.matmul %294, %163, %cst_104 {dimension_numbers = #tpu.dot_dimension_numbers<[1], [0], [0], [1], [0, 0, 1, 1], [], []>} : vector<8x32xf32>, vector<32x128xf32>, vector<8x128xf32> -> vector<8x128xf32>
    %300 = arith.addf %298, %299 : vector<8x128xf32>
    %301 = arith.negf %300 : vector<8x128xf32>
    %302 = math.exp %301 : vector<8x128xf32>
    %cst_105 = arith.constant 1.000000e+00 : f32
    %303 = vector.broadcast %cst_105 : f32 to vector<8x128xf32>
    %304 = arith.addf %303, %302 : vector<8x128xf32>
    %305 = arith.divf %303, %304 : vector<8x128xf32>
    %306 = math.tanh %300 : vector<8x128xf32>
    %307 = vector.extract_strided_slice %305 {offsets = [0, 0], sizes = [8, 32], strides = [1, 1]} : vector<8x128xf32> to vector<8x32xf32>
    %308 = vector.extract_strided_slice %305 {offsets = [0, 32], sizes = [8, 32], strides = [1, 1]} : vector<8x128xf32> to vector<8x32xf32>
    %309 = vector.extract_strided_slice %306 {offsets = [0, 64], sizes = [8, 32], strides = [1, 1]} : vector<8x128xf32> to vector<8x32xf32>
    %310 = vector.extract_strided_slice %305 {offsets = [0, 96], sizes = [8, 32], strides = [1, 1]} : vector<8x128xf32> to vector<8x32xf32>
    %311 = arith.mulf %308, %292 : vector<8x32xf32>
    %312 = arith.mulf %307, %309 : vector<8x32xf32>
    %313 = arith.addf %311, %312 : vector<8x32xf32>
    %314 = math.tanh %313 : vector<8x32xf32>
    %315 = arith.mulf %310, %314 : vector<8x32xf32>
    %cst_106 = arith.constant dense<0xFF800000> : vector<32xf32>
    %316 = vector.multi_reduction <maximumf>, %315, %cst_106 [0] : vector<8x32xf32> to vector<32xf32>
    %317 = vector.shape_cast %316 : vector<32xf32> to vector<1x32xf32>
    %c6 = arith.constant 6 : index
    %c0_107 = arith.constant 0 : index
    %318 = vector.load %arg12[%c6, %c0_107] : memref<8x32xf32, #tpu.memory_space<vmem>>, vector<1x32xf32>
    tpu.vector_store %arg12[%c6, %c0_107], %317 {strides = array<i32>} : memref<8x32xf32, #tpu.memory_space<vmem>>, vector<1x32xf32>,
    %c56_108 = arith.constant 56 : index
    %c0_109 = arith.constant 0 : index
    %319 = vector.load %arg10[%c56_108, %c0_109] : memref<64x128xf32, #tpu.memory_space<vmem>>, vector<8x128xf32>
    %cst_110 = arith.constant dense<0.000000e+00> : vector<8x128xf32>
    %320 = tpu.matmul %315, %163, %cst_110 {dimension_numbers = #tpu.dot_dimension_numbers<[1], [0], [0], [1], [0, 0, 1, 1], [], []>} : vector<8x32xf32>, vector<32x128xf32>, vector<8x128xf32> -> vector<8x128xf32>
    %321 = arith.addf %319, %320 : vector<8x128xf32>
    %322 = arith.negf %321 : vector<8x128xf32>
    %323 = math.exp %322 : vector<8x128xf32>
    %cst_111 = arith.constant 1.000000e+00 : f32
    %324 = vector.broadcast %cst_111 : f32 to vector<8x128xf32>
    %325 = arith.addf %324, %323 : vector<8x128xf32>
    %326 = arith.divf %324, %325 : vector<8x128xf32>
    %327 = math.tanh %321 : vector<8x128xf32>
    %328 = vector.extract_strided_slice %326 {offsets = [0, 0], sizes = [8, 32], strides = [1, 1]} : vector<8x128xf32> to vector<8x32xf32>
    %329 = vector.extract_strided_slice %326 {offsets = [0, 32], sizes = [8, 32], strides = [1, 1]} : vector<8x128xf32> to vector<8x32xf32>
    %330 = vector.extract_strided_slice %327 {offsets = [0, 64], sizes = [8, 32], strides = [1, 1]} : vector<8x128xf32> to vector<8x32xf32>
    %331 = vector.extract_strided_slice %326 {offsets = [0, 96], sizes = [8, 32], strides = [1, 1]} : vector<8x128xf32> to vector<8x32xf32>
    %332 = arith.mulf %329, %313 : vector<8x32xf32>
    %333 = arith.mulf %328, %330 : vector<8x32xf32>
    %334 = arith.addf %332, %333 : vector<8x32xf32>
    %335 = math.tanh %334 : vector<8x32xf32>
    %336 = arith.mulf %331, %335 : vector<8x32xf32>
    %cst_112 = arith.constant dense<0xFF800000> : vector<32xf32>
    %337 = vector.multi_reduction <maximumf>, %336, %cst_112 [0] : vector<8x32xf32> to vector<32xf32>
    %338 = vector.shape_cast %337 : vector<32xf32> to vector<1x32xf32>
    %c7 = arith.constant 7 : index
    %c0_113 = arith.constant 0 : index
    %339 = vector.load %arg12[%c7, %c0_113] : memref<8x32xf32, #tpu.memory_space<vmem>>, vector<1x32xf32>
    tpu.vector_store %arg12[%c7, %c0_113], %338 {strides = array<i32>} : memref<8x32xf32, #tpu.memory_space<vmem>>, vector<1x32xf32>,
    %c0_114 = arith.constant 0 : index
    %c0_115 = arith.constant 0 : index
    %340 = vector.load %arg12[%c0_114, %c0_115] : memref<8x32xf32, #tpu.memory_space<vmem>>, vector<8x32xf32>
    %341 = math.tanh %340 : vector<8x32xf32>
    %c0_116 = arith.constant 0 : index
    %c0_117 = arith.constant 0 : index
    %342 = vector.load %arg7[%c0_116, %c0_117] : memref<32x128xf32, #tpu.memory_space<vmem>>, vector<32x128xf32>
    %cst_118 = arith.constant dense<0.000000e+00> : vector<8x128xf32>
    %343 = tpu.matmul %341, %342, %cst_118 {dimension_numbers = #tpu.dot_dimension_numbers<[1], [0], [0], [1], [0, 0, 1, 1], [], []>} : vector<8x32xf32>, vector<32x128xf32>, vector<8x128xf32> -> vector<8x128xf32>
    %c0_119 = arith.constant 0 : index
    %c0_120 = arith.constant 0 : index
    %344 = vector.load %arg8[%c0_119, %c0_120] : memref<1x128xf32, #tpu.memory_space<vmem>>, vector<1x128xf32>
    %345 = vector.broadcast %344 : vector<1x128xf32> to vector<8x128xf32>
    %346 = arith.addf %343, %345 : vector<8x128xf32>
    %c0_121 = arith.constant 0 : index
    %c0_122 = arith.constant 0 : index
    %347 = vector.load %arg9[%c0_121, %c0_122] : memref<8x128xf32, #tpu.memory_space<vmem>>, vector<8x128xf32>
    tpu.vector_store %arg9[%c0_121, %c0_122], %346 {strides = array<i32>} : memref<8x128xf32, #tpu.memory_space<vmem>>, vector<8x128xf32>,
    return
  }
}

</mosaic_0001>

<bundles_post_ra>
// kernel: tpu_custom_call.1
= control target key start
LH: loop header
LB: loop body
LE: loop exit
PB: predicated region body
PF: predicated region fallthrough
CT: control target
= control target key end

     0   :  { %14 = vsyncpa [#allocation6], 0  ;;  %s2114_s0 = inlined_call_operand.vmem [shape: f32[64,32], index: 0, kind: input, shape index: {}]   ;;  %s2115_s1 = inlined_call_operand.vmem [shape: f32[32,128], index: 1, kind: input, shape index: {}]   ;;  %s2116_s2 = inlined_call_operand.vmem [shape: f32[32,128], index: 2, kind: input, shape index: {}]   ;;  %s2117_s3 = inlined_call_operand.vmem [shape: f32[1,128], index: 3, kind: input, shape index: {}]   ;;  %s2118_s4 = inlined_call_operand.vmem [shape: f32[32,128], index: 4, kind: input, shape index: {}]   ;;  %s2119_s5 = inlined_call_operand.hbm [shape: f32[32,128], index: 5, kind: input, shape index: {}]   ;;  %s2120_s6 = inlined_call_operand.vmem [shape: f32[1,128], index: 6, kind: input, shape index: {}]   ;;  %s2121_s7 = inlined_call_operand.hbm [shape: f32[32,128], index: 7, kind: input, shape index: {}]   ;;  %s2122_s8 = inlined_call_operand.vmem [shape: f32[1,128], index: 8, kind: input, shape index: {}]   ;;  %s2123_s9 = inlined_call_operand.hbm [shape: f32[8,128], index: 9, kind: output, shape index: {}]  }
   0x1   :  { %15 = vsyncpa [#allocation9], 0 }
   0x2   :  { %16 = vsyncpa [#allocation7], 0  ;;  %s31_s11 = sshll.u32 %s2119_s5, 4  ;;  %s1705_s12 = smov [#allocation5]   ;;  %s32_s11 = int_to_ptr.hbm [resolvable:$true] %s31_s11 }
   0x3   :  { %s33_s13 = sshll.u32 %s1705_s12, 4  ;;  %s46_s16 = sshll.u32 %s2121_s7, 4  ;;  %s34_s13 = int_to_ptr.vmem [resolvable:$true] %s33_s13  ;;  %s47_s16 = int_to_ptr.hbm [resolvable:$true] %s46_s16 }
   0x4   :  { %s1706_s17 = smov 128   ;;  %s1707_s18 = smov 8  }
   0x5   :  { %39 = dma.hbm_to_vmem [thread:$0]  %s32_s11, 512, %s34_s13, [#allocation6], %s1706_s17, %s1706_s17, %s1707_s18  }
   0x6   :  { %s1708_s19 = smov [#allocation8]  }
   0x7   :  { %s48_s20 = sshll.u32 %s1708_s19, 4  ;;  %s49_s20 = int_to_ptr.vmem [resolvable:$true] %s48_s20 }
   0x8   :  { %54 = dma.hbm_to_vmem [thread:$0]  %s47_s16, 512, %s49_s20, [#allocation9], %s1706_s17, %s1706_s17, %s1707_s18  }
   0x9   :  { %1699 = dma.done.wait [#allocation6], 512  }
   0xa   :  { %1700 = vsyncadd [#allocation6], 4294966784 }
   0xb   :  { %1701 = dma.done.wait [#allocation9], 512  }
   0xc   :  { %1702 = vsyncadd [#allocation9], 4294966784  ;;  %v68_v0 = vld [vmem:[%s2115_s1 + $0x18] sm:$0xff]  ;;  %v67_v1 = vld [vmem:[%s2115_s1 + $0x10] sm:$0xff]  ;;  %vm85_vm0 = vcmask 261120   ;;  %v1709_v9 = vmov 0.0  }
   0xd   :  { %v1778_v2 = vld [vmem:[%s2116_s2 + $0x18] sm:$0xff]  ;;  %122 = vmatpush.msra.mxu0 %v68_v0  ;;  %v1784_v3 = vld [vmem:[%s2116_s2 + $0x10] sm:$0xff]  ;;  %v66_v4 = vld [vmem:[%s2115_s1 + $0x8] sm:$0xff]  ;;  %s1710_s16 = smov 64   ;;  %s1711_s17 = smov 32  }
   0xe   :  { %175 = vmatpush.msra.mxu1 %v1778_v2  ;;  %v1792_v5 = vld [vmem:[%s2116_s2 + $0x8] sm:$0xff]  ;;  %241 = vmatpush.msra.mxu2 %v1778_v2  ;;  %v65_v6 = vld [vmem:[%s2115_s1] sm:$0xff]  ;;  %s1427_s5 = sshll.u32 %s2123_s9, 4  ;;  %s1428_s5 = int_to_ptr.hbm [resolvable:$true] %s1427_s5 }
   0xf   :  { %505 = vmatpush.msra.mxu3 %v1778_v2  ;;  %123 = vmatpush.msra.mxu0 %v67_v1  ;;  %v1803_v7 = vld [vmem:[%s2116_s2] sm:$0xff]  ;;  %v75_v37 = vld [vmem:[%s2114_s0 + $0x8] sm:$0xff]  ;;  %v76_v1 = vld [vmem:[%s2114_s0 + $0x10] sm:$0xff] }
  0x10   :  { %176 = vmatpush.msra.mxu1 %v1784_v3  ;;  %242 = vmatpush.msra.mxu2 %v1784_v3  ;;  %v74_v8 = vld [vmem:[%s2114_s0] sm:$0xff] }
  0x11   :  { %506 = vmatpush.msra.mxu3 %v1784_v3  ;;  %124 = vmatpush.msra.mxu0 %v66_v4  ;;  %v1833_v10 = vld [vmem:[%s2117_s3] ss:$0 sm:$0xff] }
  0x12   :  { %177 = vmatpush.msra.mxu1 %v1792_v5  ;;  %243 = vmatpush.msra.mxu2 %v1792_v5 }
  0x13   :  { %507 = vmatpush.msra.mxu3 %v1792_v5  ;;  %125 = vmatpush.msra.mxu0 %v65_v6 }
  0x14   :  { %178 = vmatpush.msra.mxu1 %v1803_v7  ;;  %1438 = vmatmul.msk.f32.vlgmr.msra.gmra.mxu0 %vm85_vm0, %v74_v8 }
  0x15   :  { %179 = vmatmul.f32.vlgmr.msra.gmra.mxu1 %v1709_v9  ;;  %244 = vmatpush.msra.mxu2 %v1803_v7 }
  0x16   :  { %373 = vmatpush.msrb.mxu1 %v1778_v2  ;;  %508 = vmatpush.msra.mxu3 %v1803_v7 }
  0x17   :  { %307 = vmatpush.msrb.mxu2 %v1778_v2 }
  0x18   :  { %374 = vmatpush.msrb.mxu1 %v1784_v3 }
  0x19   :  { %308 = vmatpush.msrb.mxu2 %v1784_v3 }
  0x1a   :  { %375 = vmatpush.msrb.mxu1 %v1792_v5 }
  0x1b   :  { %309 = vmatpush.msrb.mxu2 %v1792_v5 }
  0x1c   :  { %376 = vmatpush.msrb.mxu1 %v1803_v7  ;;  %1439 = vmatmul.msk.f32.gmra.mxu0 %vm85_vm0, %v75_v37 }
  0x1d   :  { %310 = vmatpush.msrb.mxu2 %v1803_v7 }
  0x1e   :  { %571 = vmatpush.msra.mxu1 %v1778_v2 }
  0x20   :  { %572 = vmatpush.msra.mxu1 %v1784_v3 }
  0x22   :  { %573 = vmatpush.msra.mxu1 %v1792_v5 }
  0x24   :  { %574 = vmatpush.msra.mxu1 %v1803_v7  ;;  %1440 = vmatmul.msk.f32.gmra.mxu0 %vm85_vm0, %v76_v1 }
  0x91   :  { %v127_v11 = vpop.f32.mrf.mxu0 }
  0x92   :  { %v180_v12 = vpop.f32.mrf.mxu1  ;;  %v128_v13 = vadd.f32 %v1833_v10, %v127_v11 }
  0x94   :  { %v183_v14 = vadd.f32 %v180_v12, %v128_v13 }
  0x96   :  { %1496 = vtanh.f32 %v183_v14  ;;  %v1446_v16 = vmul.f32 -1.442695, %v183_v14 }
  0x98   :  { %1498 = vpow2.f32 %v1446_v16 }
  0x99   :  { %v130_v39 = vpop.f32.mrf.mxu0 }
  0x9a   :  { %v131_v40 = vadd.f32 %v1833_v10, %v130_v39 }
  0x9c   :  { %v1497_v15 = vpop.eup %1496 }
  0x9d   :  { %206 = vrot.lane.b32.xlu0 %v1497_v15, %s1710_s16 }
  0x9e   :  { %v1499_v17 = vpop.eup %1498 }
  0x9f   :  { %v187_v18 = vadd.f32 1.0, %v1499_v17 }
  0xa1   :  { %1500 = vrcp.f32 %v187_v18  ;;  %v199_v24 = vand.u32 2147483648, %v187_v18  ;;  %vm193_vm2 = vweird.f32 %v187_v18  ;;  %v197_v25 = vand.u32 2147483647, %v187_v18  ;;  %v133_v6 = vpop.f32.mrf.mxu0 }
  0xa2   :  { %v134_v8 = vadd.f32 %v1833_v10, %v133_v6 }
  0xa3   :  { %v200_v27 = vor.u32 1.1754944e-38, %v199_v24  ;;  %vm198_vm4 = vcmp.eq.f32.partialorder %v197_v25, 8.507059e+37 }
  0xa7   :  { %v1501_v19 = vpop.eup %1500 }
  0xa8   :  { %v189_v20 = vmul.f32 %v1501_v19, %v187_v18  ;;  %vm194_vm1 = vweird.f32 %v1501_v19 }
  0xa9   :  { %vm195_vm3 = vmor %vm193_vm2, %vm194_vm1 }
  0xaa   :  { %v190_v21 = vsub.f32 1.0, %v189_v20 }
  0xac   :  { %v191_v22 = vmul.f32 %v1501_v19, %v190_v21 }
  0xae   :  { %v192_v23 = vadd.f32 %v1501_v19, %v191_v22 }
  0xb0   :  { %v196_v26 = vsel %vm195_vm3, %v1501_v19, %v192_v23 }
  0xb1   :  { %v201_v29 = vsel %vm198_vm4, %v200_v27, %v196_v26 }
  0xb2   :  { %v204_v31 = vmul.f32 0.0, %v201_v29 }
 0x10f   :  { %v207_v28 = vpop.permute.xlu0 %206 }
 0x110   :  { %v209_v30 = vmul.f32 %v207_v28, %v201_v29 }
 0x112   :  { %211 = vrot.lane.b32.xlu0 %v209_v30, %s1711_s17 }
 0x184   :  { %v212_v32 = vpop.permute.xlu0 %211 }
 0x185   :  { %v214_v33 = vadd.f32 %v212_v32, %v204_v31 }
 0x187   :  { %1502 = vtanh.f32 %v214_v33 }
 0x18d   :  { %v1503_v34 = vpop.eup %1502 }
 0x18e   :  { %217 = vrot.lane.b32.xlu1 %v1503_v34, %s1710_s16 }
 0x200   :  { %v218_v35 = vpop.permute.xlu1 %217 }
 0x201   :  { %v220_v36 = vmul.f32 %v218_v35, %v201_v29  ;;  %v77_v29 = vld [vmem:[%s2114_s0 + $0x18] sm:$0xff] }
 0x202   :  { %1441 = vmatmul.msk.f32.gmra.mxu0 %vm85_vm0, %v77_v29  ;;  %v688_v29 = vld [vmem:[%s2118_s4] sm:$0xff] }
 0x203   :  { %222 = vrot.lane.b32.xlu1 %v220_v36, %s1711_s17 }
 0x275   :  { %v223_v38 = vpop.permute.xlu1 %222 }
 0x276   :  { %225 = vst.msk [vmem:[#allocation3] sm:$0xff] %vm85_vm0, %v223_v38  ;;  %1447 = vmatmul.msk.f32.vlgmr.msra.gmra.mxu2 %vm85_vm0, %v223_v38 }
 0x277   :  { %439 = vmatpush.msra.mxu2 %v1778_v2 }
 0x279   :  { %440 = vmatpush.msra.mxu2 %v1784_v3 }
 0x27b   :  { %441 = vmatpush.msra.mxu2 %v1792_v5 }
 0x27d   :  { %442 = vmatpush.msra.mxu2 %v1803_v7 }
 0x2f9   :  { %v246_v41 = vpop.f32.mrf.mxu2 }
 0x2fa   :  { %v249_v42 = vadd.f32 %v246_v41, %v131_v40 }
 0x2fc   :  { %1504 = vtanh.f32 %v249_v42  ;;  %v1448_v44 = vmul.f32 -1.442695, %v249_v42 }
 0x2fe   :  { %1506 = vpow2.f32 %v1448_v44 }
 0x302   :  { %v1505_v43 = vpop.eup %1504 }
 0x303   :  { %272 = vrot.lane.b32.xlu2 %v1505_v43, %s1710_s16 }
 0x304   :  { %v1507_v45 = vpop.eup %1506 }
 0x305   :  { %v253_v46 = vadd.f32 1.0, %v1507_v45 }
 0x307   :  { %1508 = vrcp.f32 %v253_v46  ;;  %v265_v52 = vand.u32 2147483648, %v253_v46  ;;  %vm259_vm6 = vweird.f32 %v253_v46  ;;  %v263_v53 = vand.u32 2147483647, %v253_v46 }
 0x309   :  { %v266_v55 = vor.u32 1.1754944e-38, %v265_v52  ;;  %vm264_vm8 = vcmp.eq.f32.partialorder %v263_v53, 8.507059e+37 }
 0x30d   :  { %v1509_v47 = vpop.eup %1508 }
 0x30e   :  { %v255_v48 = vmul.f32 %v1509_v47, %v253_v46  ;;  %vm260_vm5 = vweird.f32 %v1509_v47 }
 0x30f   :  { %vm261_vm7 = vmor %vm259_vm6, %vm260_vm5 }
 0x310   :  { %v256_v49 = vsub.f32 1.0, %v255_v48 }
 0x312   :  { %v257_v50 = vmul.f32 %v1509_v47, %v256_v49 }
 0x314   :  { %v258_v51 = vadd.f32 %v1509_v47, %v257_v50 }
 0x316   :  { %v262_v54 = vsel %vm261_vm7, %v1509_v47, %v258_v51 }
 0x317   :  { %v267_v57 = vsel %vm264_vm8, %v266_v55, %v262_v54 }
 0x318   :  { %v270_v59 = vmul.f32 %v267_v57, %v214_v33  ;;  %v136_v33 = vpop.f32.mrf.mxu0 }
 0x319   :  { %v137_v34 = vadd.f32 %v1833_v10, %v136_v33 }
 0x35d   :  { %v273_v56 = vpop.permute.xlu2 %272 }
 0x35e   :  { %v275_v58 = vmul.f32 %v273_v56, %v267_v57 }
 0x360   :  { %277 = vrot.lane.b32.xlu2 %v275_v58, %s1711_s17 }
 0x3ba   :  { %v278_v60 = vpop.permute.xlu2 %277 }
 0x3bb   :  { %v280_v61 = vadd.f32 %v278_v60, %v270_v59  ;;  %v78_v59 = vld [vmem:[%s2114_s0 + $0x20] sm:$0xff] }
 0x3bc   :  { %1442 = vmatmul.msk.f32.gmra.mxu0 %vm85_vm0, %v78_v59 }
 0x3bd   :  { %1510 = vtanh.f32 %v280_v61 }
 0x3c3   :  { %v1511_v62 = vpop.eup %1510 }
 0x3c4   :  { %283 = vrot.lane.b32.xlu0 %v1511_v62, %s1710_s16 }
 0x436   :  { %v284_v63 = vpop.permute.xlu0 %283 }
 0x437   :  { %v286_v0 = vmul.f32 %v284_v63, %v267_v57 }
 0x439   :  { %288 = vrot.lane.b32.xlu1 %v286_v0, %s1711_s17 }
 0x4ab   :  { %v289_v4 = vpop.permute.xlu1 %288 }
 0x4ac   :  { %291 = vst.msk [vmem:[#allocation3 + $0x8] sm:$0xff] %vm85_vm0, %v289_v4  ;;  %1449 = vmatmul.msk.f32.vlgmr.msrb.gmra.mxu2 %vm85_vm0, %v289_v4 }
 0x4ad   :  { %637 = vmatpush.msrb.mxu2 %v1778_v2 }
 0x4af   :  { %638 = vmatpush.msrb.mxu2 %v1784_v3 }
 0x4b1   :  { %639 = vmatpush.msrb.mxu2 %v1792_v5 }
 0x4b3   :  { %640 = vmatpush.msrb.mxu2 %v1803_v7 }
 0x52f   :  { %v312_v11 = vpop.f32.mrf.mxu2 }
 0x530   :  { %v315_v12 = vadd.f32 %v312_v11, %v134_v8 }
 0x532   :  { %1512 = vtanh.f32 %v315_v12  ;;  %v1450_v14 = vmul.f32 -1.442695, %v315_v12 }
 0x534   :  { %1514 = vpow2.f32 %v1450_v14 }
 0x538   :  { %v1513_v13 = vpop.eup %1512 }
 0x539   :  { %338 = vrot.lane.b32.xlu2 %v1513_v13, %s1710_s16 }
 0x53a   :  { %v1515_v15 = vpop.eup %1514 }
 0x53b   :  { %v319_v16 = vadd.f32 1.0, %v1515_v15 }
 0x53d   :  { %1516 = vrcp.f32 %v319_v16  ;;  %v331_v7 = vand.u32 2147483648, %v319_v16  ;;  %vm325_vm10 = vweird.f32 %v319_v16  ;;  %v329_v19 = vand.u32 2147483647, %v319_v16 }
 0x53f   :  { %v332_v21 = vor.u32 1.1754944e-38, %v331_v7  ;;  %vm330_vm12 = vcmp.eq.f32.partialorder %v329_v19, 8.507059e+37 }
 0x543   :  { %v1517_v2 = vpop.eup %1516 }
 0x544   :  { %v321_v3 = vmul.f32 %v1517_v2, %v319_v16  ;;  %vm326_vm9 = vweird.f32 %v1517_v2 }
 0x545   :  { %vm327_vm11 = vmor %vm325_vm10, %vm326_vm9 }
 0x546   :  { %v322_v17 = vsub.f32 1.0, %v321_v3 }
 0x548   :  { %v323_v5 = vmul.f32 %v1517_v2, %v322_v17 }
 0x54a   :  { %v324_v18 = vadd.f32 %v1517_v2, %v323_v5 }
 0x54c   :  { %v328_v20 = vsel %vm327_vm11, %v1517_v2, %v324_v18 }
 0x54d   :  { %v333_v23 = vsel %vm330_vm12, %v332_v21, %v328_v20 }
 0x54e   :  { %v336_v25 = vmul.f32 %v333_v23, %v280_v61  ;;  %v139_v61 = vpop.f32.mrf.mxu0 }
 0x54f   :  { %v140_v62 = vadd.f32 %v1833_v10, %v139_v61 }
 0x593   :  { %v339_v22 = vpop.permute.xlu2 %338 }
 0x594   :  { %v341_v24 = vmul.f32 %v339_v22, %v333_v23 }
 0x596   :  { %343 = vrot.lane.b32.xlu0 %v341_v24, %s1711_s17 }
 0x608   :  { %v344_v26 = vpop.permute.xlu0 %343 }
 0x609   :  { %v346_v27 = vadd.f32 %v344_v26, %v336_v25  ;;  %v691_v25 = vld [vmem:[%s2118_s4 + $0x18] sm:$0xff]  ;;  %v690_v26 = vld [vmem:[%s2118_s4 + $0x10] sm:$0xff] }
 0x60a   :  { %744 = vmatpush.msrb.mxu3 %v691_v25 }
 0x60b   :  { %1518 = vtanh.f32 %v346_v27 }
 0x60c   :  { %745 = vmatpush.msrb.mxu3 %v690_v26 }
 0x611   :  { %v1519_v28 = vpop.eup %1518 }
 0x612   :  { %349 = vrot.lane.b32.xlu1 %v1519_v28, %s1710_s16  ;;  %v689_v28 = vld [vmem:[%s2118_s4 + $0x8] sm:$0xff] }
 0x613   :  { %746 = vmatpush.msrb.mxu3 %v689_v28 }
 0x615   :  { %747 = vmatpush.msrb.mxu3 %v688_v29 }
 0x684   :  { %v350_v30 = vpop.permute.xlu1 %349 }
 0x685   :  { %v352_v31 = vmul.f32 %v350_v30, %v333_v23 }
 0x687   :  { %354 = vrot.lane.b32.xlu2 %v352_v31, %s1711_s17  ;;  %v697_v31 = vld [vmem:[#allocation3] sm:$0xff] }
 0x6e1   :  { %v355_v32 = vpop.permute.xlu2 %354 }
 0x6e2   :  { %357 = vst.msk [vmem:[#allocation3 + $0x10] sm:$0xff] %vm85_vm0, %v355_v32  ;;  %1451 = vmatmul.msk.f32.vlgmr.msrb.gmra.mxu1 %vm85_vm0, %v355_v32  ;;  %v698_v32 = vld [vmem:[#allocation3 + $0x8] sm:$0xff] }
 0x6e9   :  { %v699_v33 = vld [vmem:[#allocation3 + $0x10] sm:$0xff] }
 0x75f   :  { %v378_v35 = vpop.f32.mrf.mxu1 }
 0x760   :  { %v381_v36 = vadd.f32 %v378_v35, %v137_v34 }
 0x762   :  { %1520 = vtanh.f32 %v381_v36  ;;  %v1452_v38 = vmul.f32 -1.442695, %v381_v36 }
 0x764   :  { %1522 = vpow2.f32 %v1452_v38 }
 0x768   :  { %v1521_v37 = vpop.eup %1520 }
 0x769   :  { %404 = vrot.lane.b32.xlu0 %v1521_v37, %s1710_s16 }
 0x76a   :  { %v1523_v39 = vpop.eup %1522 }
 0x76b   :  { %v385_v40 = vadd.f32 1.0, %v1523_v39 }
 0x76d   :  { %1524 = vrcp.f32 %v385_v40  ;;  %v397_v46 = vand.u32 2147483648, %v385_v40  ;;  %vm391_vm14 = vweird.f32 %v385_v40  ;;  %v395_v47 = vand.u32 2147483647, %v385_v40 }
 0x76f   :  { %v398_v49 = vor.u32 1.1754944e-38, %v397_v46  ;;  %vm396_vm1 = vcmp.eq.f32.partialorder %v395_v47, 8.507059e+37 }
 0x773   :  { %v1525_v41 = vpop.eup %1524 }
 0x774   :  { %v387_v42 = vmul.f32 %v1525_v41, %v385_v40  ;;  %vm392_vm13 = vweird.f32 %v1525_v41 }
 0x775   :  { %vm393_vm15 = vmor %vm391_vm14, %vm392_vm13 }
 0x776   :  { %v388_v43 = vsub.f32 1.0, %v387_v42 }
 0x778   :  { %v389_v44 = vmul.f32 %v1525_v41, %v388_v43 }
 0x77a   :  { %v390_v45 = vadd.f32 %v1525_v41, %v389_v44 }
 0x77c   :  { %v394_v48 = vsel %vm393_vm15, %v1525_v41, %v390_v45 }
 0x77d   :  { %v399_v51 = vsel %vm396_vm1, %v398_v49, %v394_v48 }
 0x77e   :  { %v402_v53 = vmul.f32 %v399_v51, %v346_v27  ;;  %v79_v27 = vld [vmem:[%s2114_s0 + $0x28] sm:$0xff] }
 0x77f   :  { %1443 = vmatmul.msk.f32.gmra.mxu0 %vm85_vm0, %v79_v27 }
 0x7db   :  { %v405_v50 = vpop.permute.xlu0 %404 }
 0x7dc   :  { %v407_v52 = vmul.f32 %v405_v50, %v399_v51 }
 0x7de   :  { %409 = vrot.lane.b32.xlu1 %v407_v52, %s1711_s17 }
 0x7fc   :  { %v142_v36 = vpop.f32.mrf.mxu0 }
 0x7fd   :  { %v143_v37 = vadd.f32 %v1833_v10, %v142_v36 }
 0x850   :  { %v410_v54 = vpop.permute.xlu1 %409 }
 0x851   :  { %v412_v55 = vadd.f32 %v410_v54, %v402_v53 }
 0x853   :  { %1526 = vtanh.f32 %v412_v55 }
 0x859   :  { %v1527_v56 = vpop.eup %1526 }
 0x85a   :  { %415 = vrot.lane.b32.xlu2 %v1527_v56, %s1710_s16 }
 0x8b4   :  { %v416_v57 = vpop.permute.xlu2 %415 }
 0x8b5   :  { %v418_v58 = vmul.f32 %v416_v57, %v399_v51 }
 0x8b7   :  { %420 = vrot.lane.b32.xlu0 %v418_v58, %s1711_s17 }
 0x929   :  { %v421_v60 = vpop.permute.xlu0 %420 }
 0x92a   :  { %423 = vst.msk [vmem:[#allocation3 + $0x18] sm:$0xff] %vm85_vm0, %v421_v60  ;;  %1453 = vmatmul.msk.f32.vlgmr.msra.gmra.mxu2 %vm85_vm0, %v421_v60  ;;  %v80_v60 = vld [vmem:[%s2114_s0 + $0x30] sm:$0xff] }
 0x92b   :  { %1444 = vmatmul.msk.f32.gmra.mxu0 %vm85_vm0, %v80_v60 }
 0x931   :  { %v700_v34 = vld [vmem:[#allocation3 + $0x18] sm:$0xff] }
 0x9ad   :  { %v444_v63 = vpop.f32.mrf.mxu2 }
 0x9ae   :  { %v447_v0 = vadd.f32 %v444_v63, %v140_v62  ;;  %v1927_v63 = vld [vmem:[#allocation5 + $0x18] sm:$0xff] }
 0x9af   :  { %794 = vmatpush.msrb.mxu1 %v1927_v63  ;;  %872 = vmatpush.msra.mxu2 %v1927_v63 }
 0x9b0   :  { %1528 = vtanh.f32 %v447_v0  ;;  %v1454_v4 = vmul.f32 -1.442695, %v447_v0  ;;  %v1929_v0 = vld [vmem:[#allocation5 + $0x10] sm:$0xff] }
 0x9b1   :  { %795 = vmatpush.msrb.mxu1 %v1929_v0  ;;  %873 = vmatpush.msra.mxu2 %v1929_v0 }
 0x9b2   :  { %1530 = vpow2.f32 %v1454_v4  ;;  %v1937_v4 = vld [vmem:[#allocation5] sm:$0xff] }
 0x9b6   :  { %v1529_v1 = vpop.eup %1528 }
 0x9b7   :  { %470 = vrot.lane.b32.xlu1 %v1529_v1, %s1710_s16  ;;  %v1933_v1 = vld [vmem:[#allocation5 + $0x8] sm:$0xff] }
 0x9b8   :  { %v1531_v6 = vpop.eup %1530  ;;  %796 = vmatpush.msrb.mxu1 %v1933_v1  ;;  %874 = vmatpush.msra.mxu2 %v1933_v1 }
 0x9b9   :  { %v451_v8 = vadd.f32 1.0, %v1531_v6 }
 0x9ba   :  { %797 = vmatpush.msrb.mxu1 %v1937_v4  ;;  %875 = vmatpush.msra.mxu2 %v1937_v4 }
 0x9bb   :  { %1532 = vrcp.f32 %v451_v8  ;;  %v463_v16 = vand.u32 2147483648, %v451_v8  ;;  %vm457_vm3 = vweird.f32 %v451_v8  ;;  %v461_v2 = vand.u32 2147483647, %v451_v8 }
 0x9bd   :  { %v464_v17 = vor.u32 1.1754944e-38, %v463_v16  ;;  %vm462_vm5 = vcmp.eq.f32.partialorder %v461_v2, 8.507059e+37 }
 0x9c1   :  { %v1533_v11 = vpop.eup %1532 }
 0x9c2   :  { %v453_v12 = vmul.f32 %v1533_v11, %v451_v8  ;;  %vm458_vm2 = vweird.f32 %v1533_v11 }
 0x9c3   :  { %vm459_vm4 = vmor %vm457_vm3, %vm458_vm2 }
 0x9c4   :  { %v454_v13 = vsub.f32 1.0, %v453_v12 }
 0x9c6   :  { %v455_v14 = vmul.f32 %v1533_v11, %v454_v13 }
 0x9c8   :  { %v456_v15 = vadd.f32 %v1533_v11, %v455_v14 }
 0x9ca   :  { %v460_v3 = vsel %vm459_vm4, %v1533_v11, %v456_v15  ;;  %v145_v11 = vpop.f32.mrf.mxu0  ;;  %v1959_v15 = vld [vmem:[%s2120_s6] ss:$0 sm:$0xff] }
 0x9cb   :  { %v465_v18 = vsel %vm462_vm5, %v464_v17, %v460_v3  ;;  %v146_v12 = vadd.f32 %v1833_v10, %v145_v11 }
 0x9cc   :  { %v468_v19 = vmul.f32 %v465_v18, %v412_v55 }
 0xa29   :  { %v471_v5 = vpop.permute.xlu1 %470 }
 0xa2a   :  { %v473_v7 = vmul.f32 %v471_v5, %v465_v18 }
 0xa2c   :  { %475 = vrot.lane.b32.xlu2 %v473_v7, %s1711_s17 }
 0xa86   :  { %v476_v20 = vpop.permute.xlu2 %475 }
 0xa87   :  { %v478_v21 = vadd.f32 %v476_v20, %v468_v19 }
 0xa89   :  { %1534 = vtanh.f32 %v478_v21 }
 0xa8f   :  { %v1535_v22 = vpop.eup %1534 }
 0xa90   :  { %481 = vrot.lane.b32.xlu0 %v1535_v22, %s1710_s16 }
 0xb02   :  { %v482_v23 = vpop.permute.xlu0 %481 }
 0xb03   :  { %v484_v24 = vmul.f32 %v482_v23, %v465_v18 }
 0xb05   :  { %486 = vrot.lane.b32.xlu1 %v484_v24, %s1711_s17 }
 0xb77   :  { %v487_v30 = vpop.permute.xlu1 %486 }
 0xb78   :  { %489 = vst.msk [vmem:[#allocation3 + $0x20] sm:$0xff] %vm85_vm0, %v487_v30  ;;  %1455 = vmatmul.msk.f32.vlgmr.msra.gmra.mxu3 %vm85_vm0, %v487_v30 }
 0xb7f   :  { %v701_v35 = vld [vmem:[#allocation3 + $0x20] sm:$0xff] }
 0xb80   :  { %1461 = vmatmul.msk.f32.vlgmr.msrb.gmra.mxu3 %vm85_vm0, %v697_v31 }
 0xb88   :  { %1462 = vmatmul.msk.f32.gmra.mxu3 %vm85_vm0, %v698_v32 }
 0xb90   :  { %1463 = vmatmul.msk.f32.gmra.mxu3 %vm85_vm0, %v699_v33 }
 0xb98   :  { %1464 = vmatmul.msk.f32.gmra.mxu3 %vm85_vm0, %v700_v34 }
 0xba0   :  { %1465 = vmatmul.msk.f32.gmra.mxu3 %vm85_vm0, %v701_v35 }
 0xbfb   :  { %v510_v38 = vpop.f32.mrf.mxu3 }
 0xbfc   :  { %v513_v39 = vadd.f32 %v510_v38, %v143_v37 }
 0xbfe   :  { %1536 = vtanh.f32 %v513_v39  ;;  %v1456_v41 = vmul.f32 -1.442695, %v513_v39 }
 0xc00   :  { %1538 = vpow2.f32 %v1456_v41 }
 0xc04   :  { %v1537_v40 = vpop.eup %1536 }
 0xc05   :  { %536 = vrot.lane.b32.xlu2 %v1537_v40, %s1710_s16 }
 0xc06   :  { %v1539_v42 = vpop.eup %1538 }
 0xc07   :  { %v517_v43 = vadd.f32 1.0, %v1539_v42 }
 0xc09   :  { %1540 = vrcp.f32 %v517_v43  ;;  %v529_v49 = vand.u32 2147483648, %v517_v43  ;;  %vm523_vm7 = vweird.f32 %v517_v43  ;;  %v527_v50 = vand.u32 2147483647, %v517_v43 }
 0xc0b   :  { %v530_v52 = vor.u32 1.1754944e-38, %v529_v49  ;;  %vm528_vm9 = vcmp.eq.f32.partialorder %v527_v50, 8.507059e+37 }
 0xc0f   :  { %v1541_v44 = vpop.eup %1540 }
 0xc10   :  { %v519_v45 = vmul.f32 %v1541_v44, %v517_v43  ;;  %vm524_vm6 = vweird.f32 %v1541_v44 }
 0xc11   :  { %vm525_vm8 = vmor %vm523_vm7, %vm524_vm6 }
 0xc12   :  { %v520_v46 = vsub.f32 1.0, %v519_v45 }
 0xc14   :  { %v521_v47 = vmul.f32 %v1541_v44, %v520_v46 }
 0xc16   :  { %v522_v48 = vadd.f32 %v1541_v44, %v521_v47 }
 0xc18   :  { %v526_v51 = vsel %vm525_vm8, %v1541_v44, %v522_v48 }
 0xc19   :  { %v531_v54 = vsel %vm528_vm9, %v530_v52, %v526_v51 }
 0xc1a   :  { %v534_v56 = vmul.f32 %v531_v54, %v478_v21 }
 0xc5f   :  { %v537_v53 = vpop.permute.xlu2 %536 }
 0xc60   :  { %v539_v55 = vmul.f32 %v537_v53, %v531_v54 }
 0xc62   :  { %541 = vrot.lane.b32.xlu0 %v539_v55, %s1711_s17 }
 0xcd4   :  { %v542_v57 = vpop.permute.xlu0 %541 }
 0xcd5   :  { %v1918_v58 = vadd.f32 %v542_v57, %v534_v56 }
 0xcd7   :  { %1542 = vtanh.f32 %v1918_v58 }
 0xcdd   :  { %v1543_v59 = vpop.eup %1542 }
 0xcde   :  { %547 = vrot.lane.b32.xlu1 %v1543_v59, %s1710_s16 }
 0xd50   :  { %v548_v61 = vpop.permute.xlu1 %547 }
 0xd51   :  { %v550_v62 = vmul.f32 %v548_v61, %v531_v54 }
 0xd53   :  { %552 = vrot.lane.b32.xlu2 %v550_v62, %s1711_s17 }
 0xdad   :  { %v553_v6 = vpop.permute.xlu2 %552 }
 0xdae   :  { %555 = vst.msk [vmem:[#allocation3 + $0x28] sm:$0xff] %vm85_vm0, %v553_v6  ;;  %1457 = vmatmul.msk.f32.vlgmr.msra.gmra.mxu1 %vm85_vm0, %v553_v6 }
 0xdaf   :  { %948 = vmatpush.msra.mxu1 %v1927_v63 }
 0xdb1   :  { %949 = vmatpush.msra.mxu1 %v1929_v0 }
 0xdb3   :  { %950 = vmatpush.msra.mxu1 %v1933_v1 }
 0xdb5   :  { %v702_v8 = vld [vmem:[#allocation3 + $0x28] sm:$0xff]  ;;  %951 = vmatpush.msra.mxu1 %v1937_v4 }
 0xdb6   :  { %1466 = vmatmul.msk.f32.gmra.mxu3 %vm85_vm0, %v702_v8  ;;  %798 = vmatmul.f32.vlgmr.msrb.gmra.mxu1 %v1709_v9  ;;  %v749_v9 = vpop.f32.mrf.mxu3 }
 0xdb7   :  { %1100 = vmatpush.msrb.mxu1 %v1927_v63  ;;  %v750_v16 = vadd.f32 %v1959_v15, %v749_v9 }
 0xdb9   :  { %1101 = vmatpush.msrb.mxu1 %v1929_v0 }
 0xdbb   :  { %1102 = vmatpush.msrb.mxu1 %v1933_v1 }
 0xdbd   :  { %1103 = vmatpush.msrb.mxu1 %v1937_v4 }
 0xdbe   :  { %v752_v6 = vpop.f32.mrf.mxu3 }
 0xdbf   :  { %v753_v8 = vadd.f32 %v1959_v15, %v752_v6 }
 0xe2b   :  { %v576_v13 = vpop.f32.mrf.mxu1 }
 0xe2c   :  { %v579_v14 = vadd.f32 %v576_v13, %v146_v12 }
 0xe2e   :  { %1544 = vtanh.f32 %v579_v14  ;;  %v1458_v10 = vmul.f32 -1.442695, %v579_v14 }
 0xe33   :  { %v799_v2 = vpop.f32.mrf.mxu1 }
 0xe34   :  { %v1545_v3 = vpop.eup %1544  ;;  %v802_v17 = vadd.f32 %v799_v2, %v750_v16 }
 0xe35   :  { %602 = vrot.lane.b32.xlu0 %v1545_v3, %s1710_s16 }
 0xe36   :  { %1546 = vtanh.f32 %v802_v17  ;;  %v1469_v18 = vmul.f32 -1.442695, %v802_v17 }
 0xe37   :  { %1548 = vpow2.f32 %v1458_v10 }
 0xe38   :  { %1550 = vpow2.f32 %v1469_v18 }
 0xe3c   :  { %v1547_v5 = vpop.eup %1546 }
 0xe3d   :  { %825 = vrot.lane.b32.xlu1 %v1547_v5, %s1710_s16  ;;  %v1549_v7 = vpop.eup %1548 }
 0xe3e   :  { %v583_v19 = vadd.f32 1.0, %v1549_v7  ;;  %v1551_v20 = vpop.eup %1550 }
 0xe3f   :  { %v806_v21 = vadd.f32 1.0, %v1551_v20 }
 0xe40   :  { %1552 = vrcp.f32 %v583_v19  ;;  %v595_v30 = vand.u32 2147483648, %v583_v19  ;;  %vm589_vm11 = vweird.f32 %v583_v19  ;;  %v593_v31 = vand.u32 2147483647, %v583_v19 }
 0xe41   :  { %1554 = vrcp.f32 %v806_v21  ;;  %v818_v39 = vand.u32 2147483648, %v806_v21  ;;  %vm812_vm15 = vweird.f32 %v806_v21  ;;  %v816_v40 = vand.u32 2147483647, %v806_v21 }
 0xe42   :  { %v596_v34 = vor.u32 1.1754944e-38, %v595_v30  ;;  %vm594_vm13 = vcmp.eq.f32.partialorder %v593_v31, 8.507059e+37  ;;  %v755_v31 = vpop.f32.mrf.mxu3 }
 0xe43   :  { %v819_v42 = vor.u32 1.1754944e-38, %v818_v39  ;;  %vm817_vm2 = vcmp.eq.f32.partialorder %v816_v40, 8.507059e+37 }
 0xe46   :  { %v1553_v22 = vpop.eup %1552 }
 0xe47   :  { %v585_v23 = vmul.f32 %v1553_v22, %v583_v19  ;;  %v1555_v25 = vpop.eup %1554  ;;  %vm590_vm10 = vweird.f32 %v1553_v22 }
 0xe48   :  { %v808_v27 = vmul.f32 %v1555_v25, %v806_v21  ;;  %vm591_vm12 = vmor %vm589_vm11, %vm590_vm10  ;;  %vm813_vm14 = vweird.f32 %v1555_v25 }
 0xe49   :  { %v586_v24 = vsub.f32 1.0, %v585_v23  ;;  %vm814_vm1 = vmor %vm812_vm15, %vm813_vm14 }
 0xe4a   :  { %v809_v29 = vsub.f32 1.0, %v808_v27 }
 0xe4b   :  { %v587_v26 = vmul.f32 %v1553_v22, %v586_v24 }
 0xe4c   :  { %v810_v33 = vmul.f32 %v1555_v25, %v809_v29 }
 0xe4d   :  { %v588_v28 = vadd.f32 %v1553_v22, %v587_v26 }
 0xe4e   :  { %v811_v38 = vadd.f32 %v1555_v25, %v810_v33 }
 0xe4f   :  { %v592_v32 = vsel %vm591_vm12, %v1553_v22, %v588_v28 }
 0xe50   :  { %v597_v36 = vsel %vm594_vm13, %v596_v34, %v592_v32  ;;  %v815_v41 = vsel %vm814_vm1, %v1555_v25, %v811_v38  ;;  %v756_v32 = vadd.f32 %v1959_v15, %v755_v31 }
 0xe51   :  { %v820_v44 = vsel %vm817_vm2, %v819_v42, %v815_v41  ;;  %v600_v46 = vmul.f32 %v597_v36, %v1918_v58  ;;  %v81_v58 = vld [vmem:[%s2114_s0 + $0x38] sm:$0xff] }
 0xe52   :  { %v823_v50 = vmul.f32 0.0, %v820_v44  ;;  %1445 = vmatmul.msk.f32.gmra.mxu0 %vm85_vm0, %v81_v58 }
 0xea7   :  { %v603_v35 = vpop.permute.xlu0 %602 }
 0xea8   :  { %v605_v37 = vmul.f32 %v603_v35, %v597_v36 }
 0xeaa   :  { %607 = vrot.lane.b32.xlu2 %v605_v37, %s1711_s17 }
 0xeaf   :  { %v826_v43 = vpop.permute.xlu1 %825 }
 0xeb0   :  { %v828_v45 = vmul.f32 %v826_v43, %v820_v44 }
 0xeb2   :  { %830 = vrot.lane.b32.xlu0 %v828_v45, %s1711_s17 }
 0xf04   :  { %v608_v47 = vpop.permute.xlu2 %607 }
 0xf05   :  { %v1967_v48 = vadd.f32 %v608_v47, %v600_v46 }
 0xf07   :  { %1556 = vtanh.f32 %v1967_v48 }
 0xf0d   :  { %v1557_v49 = vpop.eup %1556 }
 0xf0e   :  { %613 = vrot.lane.b32.xlu1 %v1557_v49, %s1710_s16 }
 0xf24   :  { %v831_v51 = vpop.permute.xlu0 %830 }
 0xf25   :  { %v833_v52 = vadd.f32 %v831_v51, %v823_v50 }
 0xf27   :  { %1558 = vtanh.f32 %v833_v52 }
 0xf2d   :  { %v1559_v53 = vpop.eup %1558 }
 0xf2e   :  { %836 = vrot.lane.b32.xlu2 %v1559_v53, %s1710_s16 }
 0xf80   :  { %v614_v54 = vpop.permute.xlu1 %613 }
 0xf81   :  { %v616_v55 = vmul.f32 %v614_v54, %v597_v36 }
 0xf83   :  { %618 = vrot.lane.b32.xlu0 %v616_v55, %s1711_s17 }
 0xf88   :  { %v837_v56 = vpop.permute.xlu2 %836 }
 0xf89   :  { %v1973_v57 = vmul.f32 %v837_v56, %v820_v44 }
 0xf8b   :  { %856 = vrot.lane.b32.xlu1 %v1973_v57, %s1711_s17 }
 0xff5   :  { %v619_v59 = vpop.permute.xlu0 %618 }
 0xff6   :  { %621 = vst.msk [vmem:[#allocation3 + $0x30] sm:$0xff] %vm85_vm0, %v619_v59  ;;  %1459 = vmatmul.msk.f32.vlgmr.msrb.gmra.mxu2 %vm85_vm0, %v619_v59 }
 0xff7   :  { %1024 = vmatpush.msrb.mxu2 %v1927_v63 }
 0xff9   :  { %1025 = vmatpush.msrb.mxu2 %v1929_v0 }
 0xffb   :  { %1026 = vmatpush.msrb.mxu2 %v1933_v1 }
 0xffd   :  { %v857_v60 = vpop.permute.xlu1 %856  ;;  %v703_v61 = vld [vmem:[#allocation3 + $0x30] sm:$0xff]  ;;  %1027 = vmatpush.msrb.mxu2 %v1937_v4 }
 0xffe   :  { %1467 = vmatmul.msk.f32.gmra.mxu3 %vm85_vm0, %v703_v61  ;;  %1470 = vmatmul.msk.f32.vlgmr.msra.gmra.mxu2 %vm85_vm0, %v857_v60  ;;  %v758_v60 = vpop.f32.mrf.mxu3 }
 0xfff   :  { %1176 = vmatpush.msra.mxu2 %v1927_v63  ;;  %v759_v61 = vadd.f32 %v1959_v15, %v758_v60 }
0x1001   :  { %1177 = vmatpush.msra.mxu2 %v1929_v0 }
0x1003   :  { %1178 = vmatpush.msra.mxu2 %v1933_v1 }
0x1005   :  { %1179 = vmatpush.msra.mxu2 %v1937_v4 }
0x1079   :  { %v1993_v62 = vpop.f32.mrf.mxu2 }
0x1081   :  { %v877_v11 = vpop.f32.mrf.mxu2 }
0x1082   :  { %v880_v12 = vadd.f32 %v877_v11, %v753_v8 }
0x1084   :  { %1560 = vtanh.f32 %v880_v12  ;;  %v1471_v14 = vmul.f32 -1.442695, %v880_v12 }
0x1086   :  { %1562 = vpow2.f32 %v1471_v14 }
0x108a   :  { %v1561_v13 = vpop.eup %1560 }
0x108b   :  { %903 = vrot.lane.b32.xlu2 %v1561_v13, %s1710_s16 }
0x108c   :  { %v1563_v9 = vpop.eup %1562 }
0x108d   :  { %v884_v16 = vadd.f32 1.0, %v1563_v9 }
0x108f   :  { %1564 = vrcp.f32 %v884_v16  ;;  %v896_v18 = vand.u32 2147483648, %v884_v16  ;;  %vm890_vm4 = vweird.f32 %v884_v16  ;;  %v894_v7 = vand.u32 2147483647, %v884_v16 }
0x1091   :  { %v897_v20 = vor.u32 1.1754944e-38, %v896_v18  ;;  %vm895_vm6 = vcmp.eq.f32.partialorder %v894_v7, 8.507059e+37 }
0x1095   :  { %v1565_v2 = vpop.eup %1564 }
0x1096   :  { %v886_v3 = vmul.f32 %v1565_v2, %v884_v16  ;;  %vm891_vm3 = vweird.f32 %v1565_v2 }
0x1097   :  { %vm892_vm5 = vmor %vm890_vm4, %vm891_vm3 }
0x1098   :  { %v887_v17 = vsub.f32 1.0, %v886_v3 }
0x109a   :  { %v888_v5 = vmul.f32 %v1565_v2, %v887_v17 }
0x109c   :  { %v889_v10 = vadd.f32 %v1565_v2, %v888_v5 }
0x109e   :  { %v893_v19 = vsel %vm892_vm5, %v1565_v2, %v889_v10 }
0x109f   :  { %v898_v22 = vsel %vm895_vm6, %v897_v20, %v893_v19 }
0x10a0   :  { %v901_v24 = vmul.f32 %v898_v22, %v833_v52 }
0x10e5   :  { %v904_v21 = vpop.permute.xlu2 %903 }
0x10e6   :  { %v906_v23 = vmul.f32 %v904_v21, %v898_v22 }
0x10e8   :  { %908 = vrot.lane.b32.xlu0 %v906_v23, %s1711_s17 }
0x115a   :  { %v909_v25 = vpop.permute.xlu0 %908 }
0x115b   :  { %v911_v26 = vadd.f32 %v909_v25, %v901_v24  ;;  %v761_v25 = vpop.f32.mrf.mxu3 }
0x115d   :  { %1566 = vtanh.f32 %v911_v26 }
0x1163   :  { %v1567_v27 = vpop.eup %1566 }
0x1164   :  { %914 = vrot.lane.b32.xlu1 %v1567_v27, %s1710_s16 }
0x11d6   :  { %v915_v28 = vpop.permute.xlu1 %914 }
0x11d7   :  { %v1999_v29 = vmul.f32 %v915_v28, %v898_v22 }
0x11d9   :  { %932 = vrot.lane.b32.xlu2 %v1999_v29, %s1711_s17 }
0x1233   :  { %v933_v30 = vpop.permute.xlu2 %932 }
0x1234   :  { %1472 = vmatmul.msk.f32.vlgmr.msra.gmra.mxu1 %vm85_vm0, %v933_v30 }
0x1235   :  { %1252 = vmatpush.msra.mxu1 %v1927_v63 }
0x1237   :  { %1253 = vmatpush.msra.mxu1 %v1929_v0 }
0x1239   :  { %1254 = vmatpush.msra.mxu1 %v1933_v1 }
0x123b   :  { %1255 = vmatpush.msra.mxu1 %v1937_v4 }
0x12b1   :  { %v953_v33 = vpop.f32.mrf.mxu1 }
0x12b2   :  { %v956_v34 = vadd.f32 %v953_v33, %v756_v32 }
0x12b4   :  { %1568 = vtanh.f32 %v956_v34  ;;  %v1473_v36 = vmul.f32 -1.442695, %v956_v34 }
0x12b6   :  { %1570 = vpow2.f32 %v1473_v36 }
0x12ba   :  { %v1569_v35 = vpop.eup %1568 }
0x12bb   :  { %979 = vrot.lane.b32.xlu0 %v1569_v35, %s1710_s16 }
0x12bc   :  { %v1571_v37 = vpop.eup %1570 }
0x12bd   :  { %v960_v38 = vadd.f32 1.0, %v1571_v37 }
0x12bf   :  { %1572 = vrcp.f32 %v960_v38  ;;  %v972_v44 = vand.u32 2147483648, %v960_v38  ;;  %vm966_vm8 = vweird.f32 %v960_v38  ;;  %v970_v45 = vand.u32 2147483647, %v960_v38 }
0x12c1   :  { %v973_v47 = vor.u32 1.1754944e-38, %v972_v44  ;;  %vm971_vm10 = vcmp.eq.f32.partialorder %v970_v45, 8.507059e+37 }
0x12c5   :  { %v1573_v39 = vpop.eup %1572 }
0x12c6   :  { %v962_v40 = vmul.f32 %v1573_v39, %v960_v38  ;;  %vm967_vm7 = vweird.f32 %v1573_v39 }
0x12c7   :  { %vm968_vm9 = vmor %vm966_vm8, %vm967_vm7 }
0x12c8   :  { %v963_v41 = vsub.f32 1.0, %v962_v40 }
0x12ca   :  { %v964_v42 = vmul.f32 %v1573_v39, %v963_v41 }
0x12cc   :  { %v965_v43 = vadd.f32 %v1573_v39, %v964_v42 }
0x12ce   :  { %v969_v46 = vsel %vm968_vm9, %v1573_v39, %v965_v43 }
0x12cf   :  { %v974_v50 = vsel %vm971_vm10, %v973_v47, %v969_v46 }
0x12d0   :  { %v977_v52 = vmul.f32 %v974_v50, %v911_v26  ;;  %v762_v26 = vadd.f32 %v1959_v15, %v761_v25 }
0x132d   :  { %v980_v49 = vpop.permute.xlu0 %979 }
0x132e   :  { %v982_v51 = vmul.f32 %v980_v49, %v974_v50 }
0x1330   :  { %984 = vrot.lane.b32.xlu1 %v982_v51, %s1711_s17 }
0x13a2   :  { %v985_v53 = vpop.permute.xlu1 %984 }
0x13a3   :  { %v987_v54 = vadd.f32 %v985_v53, %v977_v52 }
0x13a5   :  { %1574 = vtanh.f32 %v987_v54 }
0x13ab   :  { %v1575_v55 = vpop.eup %1574 }
0x13ac   :  { %990 = vrot.lane.b32.xlu2 %v1575_v55, %s1710_s16 }
0x1406   :  { %v991_v56 = vpop.permute.xlu2 %990 }
0x1407   :  { %v2012_v58 = vmul.f32 %v991_v56, %v974_v50 }
0x1409   :  { %1008 = vrot.lane.b32.xlu0 %v2012_v58, %s1711_s17 }
0x147b   :  { %v1009_v59 = vpop.permute.xlu0 %1008 }
0x147c   :  { %1474 = vmatmul.msk.f32.vlgmr.msrb.gmra.mxu2 %vm85_vm0, %v1009_v59 }
0x147d   :  { %1328 = vmatpush.msrb.mxu2 %v1927_v63 }
0x147f   :  { %1329 = vmatpush.msrb.mxu2 %v1929_v0 }
0x1481   :  { %1330 = vmatpush.msrb.mxu2 %v1933_v1 }
0x1483   :  { %1331 = vmatpush.msrb.mxu2 %v1937_v4 }
0x14ff   :  { %v1029_v6 = vpop.f32.mrf.mxu2 }
0x1500   :  { %v1032_v8 = vadd.f32 %v1029_v6, %v759_v61 }
0x1502   :  { %1576 = vtanh.f32 %v1032_v8  ;;  %v1475_v12 = vmul.f32 -1.442695, %v1032_v8 }
0x1504   :  { %1578 = vpow2.f32 %v1475_v12 }
0x1508   :  { %v1577_v11 = vpop.eup %1576 }
0x1509   :  { %1055 = vrot.lane.b32.xlu1 %v1577_v11, %s1710_s16 }
0x150a   :  { %v1579_v13 = vpop.eup %1578 }
0x150b   :  { %v1036_v14 = vadd.f32 1.0, %v1579_v13 }
0x150d   :  { %1580 = vrcp.f32 %v1036_v14  ;;  %v1048_v4 = vand.u32 2147483648, %v1036_v14  ;;  %vm1042_vm12 = vweird.f32 %v1036_v14  ;;  %v1046_v2 = vand.u32 2147483647, %v1036_v14 }
0x150f   :  { %v1049_v17 = vor.u32 1.1754944e-38, %v1048_v4  ;;  %vm1047_vm14 = vcmp.eq.f32.partialorder %v1046_v2, 8.507059e+37 }
0x1513   :  { %v1581_v63 = vpop.eup %1580 }
0x1514   :  { %v1038_v0 = vmul.f32 %v1581_v63, %v1036_v14  ;;  %vm1043_vm11 = vweird.f32 %v1581_v63 }
0x1515   :  { %vm1044_vm13 = vmor %vm1042_vm12, %vm1043_vm11 }
0x1516   :  { %v1039_v9 = vsub.f32 1.0, %v1038_v0 }
0x1518   :  { %v1040_v1 = vmul.f32 %v1581_v63, %v1039_v9 }
0x151a   :  { %v1041_v16 = vadd.f32 %v1581_v63, %v1040_v1 }
0x151c   :  { %v1045_v3 = vsel %vm1044_vm13, %v1581_v63, %v1041_v16  ;;  %v148_v63 = vpop.f32.mrf.mxu0  ;;  %v1626_v16 = vld [vmem:[%s2117_s3] ss:$0 sm:$0xff] }
0x151d   :  { %v1050_v10 = vsel %vm1047_vm14, %v1049_v17, %v1045_v3  ;;  %v149_v4 = vadd.f32 %v1626_v16, %v148_v63 }
0x151e   :  { %v1053_v7 = vmul.f32 %v1050_v10, %v987_v54  ;;  %v764_v54 = vpop.f32.mrf.mxu3 }
0x151f   :  { %v765_v55 = vadd.f32 %v1959_v15, %v764_v54  ;;  %v645_v17 = vadd.f32 %v1993_v62, %v149_v4 }
0x157b   :  { %v1056_v5 = vpop.permute.xlu1 %1055 }
0x157c   :  { %v1058_v18 = vmul.f32 %v1056_v5, %v1050_v10 }
0x157e   :  { %1060 = vrot.lane.b32.xlu2 %v1058_v18, %s1711_s17 }
0x15d8   :  { %v1061_v19 = vpop.permute.xlu2 %1060 }
0x15d9   :  { %v1063_v20 = vadd.f32 %v1061_v19, %v1053_v7 }
0x15db   :  { %1582 = vtanh.f32 %v1063_v20 }
0x15e1   :  { %v1583_v21 = vpop.eup %1582 }
0x15e2   :  { %1066 = vrot.lane.b32.xlu0 %v1583_v21, %s1710_s16 }
0x1654   :  { %v1067_v22 = vpop.permute.xlu0 %1066 }
0x1655   :  { %v2025_v23 = vmul.f32 %v1067_v22, %v1050_v10 }
0x1657   :  { %1084 = vrot.lane.b32.xlu1 %v2025_v23, %s1711_s17 }
0x16c9   :  { %v1085_v24 = vpop.permute.xlu1 %1084 }
0x16ca   :  { %1476 = vmatmul.msk.f32.vlgmr.msrb.gmra.mxu1 %vm85_vm0, %v1085_v24  ;;  %v1460_v24 = vmul.f32 -1.442695, %v645_v17 }
0x1747   :  { %v1105_v27 = vpop.f32.mrf.mxu1 }
0x1748   :  { %v1108_v28 = vadd.f32 %v1105_v27, %v762_v26 }
0x174a   :  { %1584 = vtanh.f32 %v1108_v28  ;;  %v1477_v31 = vmul.f32 -1.442695, %v1108_v28 }
0x174c   :  { %1586 = vpow2.f32 %v1477_v31 }
0x1750   :  { %v1585_v30 = vpop.eup %1584 }
0x1751   :  { %1131 = vrot.lane.b32.xlu2 %v1585_v30, %s1710_s16 }
0x1752   :  { %v1587_v32 = vpop.eup %1586 }
0x1753   :  { %v1112_v33 = vadd.f32 1.0, %v1587_v32 }
0x1755   :  { %1588 = vrcp.f32 %v1112_v33  ;;  %v1124_v39 = vand.u32 2147483648, %v1112_v33  ;;  %vm1118_vm1 = vweird.f32 %v1112_v33  ;;  %v1122_v40 = vand.u32 2147483647, %v1112_v33 }
0x1757   :  { %v1125_v42 = vor.u32 1.1754944e-38, %v1124_v39  ;;  %vm1123_vm3 = vcmp.eq.f32.partialorder %v1122_v40, 8.507059e+37 }
0x175b   :  { %v1589_v34 = vpop.eup %1588 }
0x175c   :  { %v1114_v35 = vmul.f32 %v1589_v34, %v1112_v33  ;;  %vm1119_vm15 = vweird.f32 %v1589_v34 }
0x175d   :  { %vm1120_vm2 = vmor %vm1118_vm1, %vm1119_vm15  ;;  %vm840_vm1 = vcmask 1048320  }
0x175e   :  { %v1115_v36 = vsub.f32 1.0, %v1114_v35 }
0x1760   :  { %v1116_v37 = vmul.f32 %v1589_v34, %v1115_v36 }
0x1762   :  { %v1117_v38 = vadd.f32 %v1589_v34, %v1116_v37 }
0x1764   :  { %v1121_v41 = vsel %vm1120_vm2, %v1589_v34, %v1117_v38 }
0x1765   :  { %v1126_v44 = vsel %vm1123_vm3, %v1125_v42, %v1121_v41  ;;  %v767_v42 = vpop.f32.mrf.mxu3 }
0x1766   :  { %v1129_v46 = vmul.f32 %v1126_v44, %v1063_v20 }
0x17ab   :  { %v1132_v43 = vpop.permute.xlu2 %1131 }
0x17ac   :  { %v1134_v45 = vmul.f32 %v1132_v43, %v1126_v44  ;;  %v768_v43 = vadd.f32 %v1959_v15, %v767_v42 }
0x17ae   :  { %1136 = vrot.lane.b32.xlu0 %v1134_v45, %s1711_s17 }
0x1820   :  { %v1137_v47 = vpop.permute.xlu0 %1136 }
0x1821   :  { %v1139_v49 = vadd.f32 %v1137_v47, %v1129_v46 }
0x1823   :  { %1590 = vtanh.f32 %v1139_v49 }
0x1829   :  { %v1591_v50 = vpop.eup %1590 }
0x182a   :  { %1142 = vrot.lane.b32.xlu1 %v1591_v50, %s1710_s16 }
0x189c   :  { %v1143_v51 = vpop.permute.xlu1 %1142 }
0x189d   :  { %v2034_v52 = vmul.f32 %v1143_v51, %v1126_v44 }
0x189f   :  { %1160 = vrot.lane.b32.xlu2 %v2034_v52, %s1711_s17 }
0x18f9   :  { %v1161_v53 = vpop.permute.xlu2 %1160 }
0x18fa   :  { %1478 = vmatmul.msk.f32.vlgmr.msra.gmra.mxu2 %vm85_vm0, %v1161_v53 }
0x197d   :  { %v1181_v56 = vpop.f32.mrf.mxu2 }
0x197e   :  { %v1184_v59 = vadd.f32 %v1181_v56, %v765_v55 }
0x1980   :  { %1592 = vtanh.f32 %v1184_v59  ;;  %v1479_v61 = vmul.f32 -1.442695, %v1184_v59 }
0x1982   :  { %1594 = vpow2.f32 %v1479_v61 }
0x1986   :  { %v1593_v60 = vpop.eup %1592 }
0x1987   :  { %1207 = vrot.lane.b32.xlu0 %v1593_v60, %s1710_s16 }
0x1988   :  { %v1595_v6 = vpop.eup %1594 }
0x1989   :  { %v1188_v8 = vadd.f32 1.0, %v1595_v6 }
0x198b   :  { %1596 = vrcp.f32 %v1188_v8  ;;  %v1200_v9 = vand.u32 2147483648, %v1188_v8  ;;  %vm1194_vm5 = vweird.f32 %v1188_v8  ;;  %v1198_v1 = vand.u32 2147483647, %v1188_v8 }
0x198c   :  { %1598 = vtanh.f32 %v645_v17 }
0x198d   :  { %v1201_v3 = vor.u32 1.1754944e-38, %v1200_v9  ;;  %vm1199_vm7 = vcmp.eq.f32.partialorder %v1198_v1, 8.507059e+37 }
0x1991   :  { %v1597_v11 = vpop.eup %1596 }
0x1992   :  { %v1190_v12 = vmul.f32 %v1597_v11, %v1188_v8  ;;  %vm1195_vm4 = vweird.f32 %v1597_v11  ;;  %v1599_v7 = vpop.eup %1598 }
0x1993   :  { %vm1196_vm6 = vmor %vm1194_vm5, %vm1195_vm4 }
0x1994   :  { %v1191_v13 = vsub.f32 1.0, %v1190_v12 }
0x1996   :  { %v1192_v14 = vmul.f32 %v1597_v11, %v1191_v13 }
0x1998   :  { %v1193_v0 = vadd.f32 %v1597_v11, %v1192_v14 }
0x199a   :  { %v1197_v2 = vsel %vm1196_vm6, %v1597_v11, %v1193_v0  ;;  %vm852_vm6 = vcmask 253952  }
0x199b   :  { %v1202_v10 = vsel %vm1199_vm7, %v1201_v3, %v1197_v2 }
0x199c   :  { %v1205_v19 = vmul.f32 %v1202_v10, %v1139_v49 }
0x19f9   :  { %v1208_v5 = vpop.permute.xlu0 %1207 }
0x19fa   :  { %v1210_v18 = vmul.f32 %v1208_v5, %v1202_v10 }
0x19fc   :  { %1212 = vrot.lane.b32.xlu1 %v1210_v18, %s1711_s17 }
0x1a04   :  { %668 = vrot.lane.b32.xlu1 %v1599_v7, %s1710_s16  ;;  %v841_v7 = vsel %vm840_vm1, %v1973_v57, -inf }
0x1a6e   :  { %v1213_v20 = vpop.permute.xlu1 %1212 }
0x1a6f   :  { %v2047_v21 = vadd.f32 %v1213_v20, %v1205_v19  ;;  %v842_v19 = vrot.slane %v841_v7, 4 }
0x1a71   :  { %1600 = vtanh.f32 %v2047_v21 }
0x1a72   :  { %1602 = vpow2.f32 %v1460_v24 }
0x1a76   :  { %v669_v38 = vpop.permute.xlu1 %668 }
0x1a77   :  { %v1601_v22 = vpop.eup %1600 }
0x1a78   :  { %1218 = vrot.lane.b32.xlu2 %v1601_v22, %s1710_s16  ;;  %v1603_v62 = vpop.eup %1602  ;;  %v843_v22 = vmax.f32 %v841_v7, %v842_v19 }
0x1a79   :  { %v649_v25 = vadd.f32 1.0, %v1603_v62  ;;  %v1070_v62 = vsel %vm840_vm1, %v2025_v23, -inf }
0x1a7b   :  { %1604 = vrcp.f32 %v649_v25  ;;  %v661_v34 = vand.u32 2147483648, %v649_v25  ;;  %vm655_vm9 = vweird.f32 %v649_v25  ;;  %v659_v35 = vand.u32 2147483647, %v649_v25 }
0x1a7d   :  { %v662_v37 = vor.u32 1.1754944e-38, %v661_v34  ;;  %vm660_vm11 = vcmp.eq.f32.partialorder %v659_v35, 8.507059e+37 }
0x1a81   :  { %v1605_v26 = vpop.eup %1604 }
0x1a82   :  { %v651_v27 = vmul.f32 %v1605_v26, %v649_v25  ;;  %vm656_vm8 = vweird.f32 %v1605_v26 }
0x1a83   :  { %vm657_vm10 = vmor %vm655_vm9, %vm656_vm8 }
0x1a84   :  { %v652_v28 = vsub.f32 1.0, %v651_v27  ;;  %v1071_v27 = vrot.slane %v1070_v62, 4 }
0x1a86   :  { %v653_v30 = vmul.f32 %v1605_v26, %v652_v28 }
0x1a88   :  { %v654_v32 = vadd.f32 %v1605_v26, %v653_v30  ;;  %v1072_v30 = vmax.f32 %v1070_v62, %v1071_v27 }
0x1a8a   :  { %v658_v36 = vsel %vm657_vm10, %v1605_v26, %v654_v32  ;;  %v844_v26 = vrot.slane %v843_v22, 2  ;;  %v1073_v57 = vrot.slane %v1072_v30, 2 }
0x1a8b   :  { %v663_v39 = vsel %vm660_vm11, %v662_v37, %v658_v36 }
0x1a8c   :  { %v671_v40 = vmul.f32 %v669_v38, %v663_v39  ;;  %v666_v47 = vmul.f32 %v663_v39, %v1967_v48  ;;  %v845_v28 = vmax.f32 %v843_v22, %v844_v26 }
0x1a8e   :  { %v846_v35 = vrot.slane %v845_v28, 1 }
0x1a90   :  { %v847_v37 = vmax.f32 %v845_v28, %v846_v35 }
0x1ad2   :  { %v1219_v31 = vpop.permute.xlu2 %1218 }
0x1ad3   :  { %v2051_v33 = vmul.f32 %v1219_v31, %v1202_v10 }
0x1ad5   :  { %1236 = vrot.lane.b32.xlu0 %v2051_v33, %s1711_s17 }
0x1add   :  { %673 = vrot.lane.b32.xlu0 %v671_v40, %s1711_s17 }
0x1b47   :  { %v1237_v41 = vpop.permute.xlu0 %1236 }
0x1b48   :  { %1480 = vmatmul.msk.f32.vlgmr.msra.gmra.mxu1 %vm85_vm0, %v1237_v41 }
0x1b4f   :  { %v674_v46 = vpop.permute.xlu0 %673 }
0x1b50   :  { %v676_v49 = vadd.f32 %v674_v46, %v666_v47 }
0x1bc5   :  { %v1257_v44 = vpop.f32.mrf.mxu1 }
0x1bc6   :  { %v1260_v45 = vadd.f32 %v1257_v44, %v768_v43 }
0x1bc8   :  { %1606 = vtanh.f32 %v1260_v45  ;;  %v1481_v53 = vmul.f32 -1.442695, %v1260_v45 }
0x1bc9   :  { %1608 = vtanh.f32 %v676_v49 }
0x1bca   :  { %1610 = vpow2.f32 %v1481_v53 }
0x1bce   :  { %v1607_v50 = vpop.eup %1606 }
0x1bcf   :  { %1283 = vrot.lane.b32.xlu2 %v1607_v50, %s1710_s16  ;;  %v1609_v51 = vpop.eup %1608  ;;  %v918_v50 = vsel %vm840_vm1, %v1999_v29, -inf }
0x1bd0   :  { %v1611_v54 = vpop.eup %1610 }
0x1bd1   :  { %v1264_v55 = vadd.f32 1.0, %v1611_v54 }
0x1bd3   :  { %1612 = vrcp.f32 %v1264_v55  ;;  %v1276_v48 = vand.u32 2147483648, %v1264_v55  ;;  %vm1270_vm13 = vweird.f32 %v1264_v55  ;;  %v1274_v8 = vand.u32 2147483647, %v1264_v55 }
0x1bd5   :  { %v1277_v12 = vor.u32 1.1754944e-38, %v1276_v48  ;;  %vm1275_vm15 = vcmp.eq.f32.partialorder %v1274_v8, 8.507059e+37 }
0x1bd7   :  { %679 = vrot.lane.b32.xlu2 %v1609_v51, %s1710_s16  ;;  %v919_v51 = vrot.slane %v918_v50, 4 }
0x1bd9   :  { %v1613_v56 = vpop.eup %1612  ;;  %v920_v54 = vmax.f32 %v918_v50, %v919_v51  ;;  %v1495_v50 = vld [vmem:[%s2122_s8] ss:$0 sm:$0xff] }
0x1bda   :  { %v1266_v59 = vmul.f32 %v1613_v56, %v1264_v55  ;;  %vm1271_vm12 = vweird.f32 %v1613_v56 }
0x1bdb   :  { %vm1272_vm14 = vmor %vm1270_vm13, %vm1271_vm12 }
0x1bdc   :  { %v1267_v60 = vsub.f32 1.0, %v1266_v59 }
0x1bde   :  { %v1268_v61 = vmul.f32 %v1613_v56, %v1267_v60 }
0x1be0   :  { %v1269_v6 = vadd.f32 %v1613_v56, %v1268_v61  ;;  %v921_v61 = vrot.slane %v920_v54, 2 }
0x1be2   :  { %v1273_v11 = vsel %vm1272_vm14, %v1613_v56, %v1269_v6  ;;  %v1146_v56 = vsel %vm840_vm1, %v2034_v52, -inf  ;;  %v922_v29 = vmax.f32 %v920_v54, %v921_v61 }
0x1be3   :  { %v1278_v14 = vsel %vm1275_vm15, %v1277_v12, %v1273_v11  ;;  %v1147_v6 = vrot.slane %v1146_v56, 4 }
0x1be4   :  { %v1281_v1 = vmul.f32 %v1278_v14, %v2047_v21 }
0x1c29   :  { %v1284_v13 = vpop.permute.xlu2 %1283 }
0x1c2a   :  { %v1286_v63 = vmul.f32 %v1284_v13, %v1278_v14  ;;  %v1148_v13 = vmax.f32 %v1146_v56, %v1147_v6 }
0x1c2c   :  { %1288 = vrot.lane.b32.xlu1 %v1286_v63, %s1711_s17  ;;  %v1149_v63 = vrot.slane %v1148_v13, 2 }
0x1c31   :  { %v680_v0 = vpop.permute.xlu2 %679 }
0x1c32   :  { %v682_v9 = vmul.f32 %v680_v0, %v663_v39  ;;  %v923_v0 = vrot.slane %v922_v29, 1 }
0x1c34   :  { %684 = vrot.lane.b32.xlu1 %v682_v9, %s1711_s17  ;;  %v1150_v9 = vmax.f32 %v1148_v13, %v1149_v63 }
0x1c9e   :  { %v1289_v16 = vpop.permute.xlu1 %1288 }
0x1c9f   :  { %v2064_v4 = vadd.f32 %v1289_v16, %v1281_v1  ;;  %v924_v1 = vmax.f32 %v922_v29, %v923_v0  ;;  %v1151_v16 = vrot.slane %v1150_v9, 1 }
0x1ca1   :  { %1614 = vtanh.f32 %v2064_v4 }
0x1ca6   :  { %v685_v2 = vpop.permute.xlu1 %684 }
0x1ca7   :  { %v1615_v3 = vpop.eup %1614  ;;  %687 = vst.msk [vmem:[#allocation3 + $0x38] sm:$0xff] %vm85_vm0, %v685_v2 }
0x1ca8   :  { %1294 = vrot.lane.b32.xlu0 %v1615_v3, %s1710_s16  ;;  %v1152_v3 = vmax.f32 %v1150_v9, %v1151_v16 }
0x1cae   :  { %v704_v17 = vld [vmem:[#allocation3 + $0x38] sm:$0xff] }
0x1caf   :  { %1468 = vmatmul.msk.f32.gmra.mxu3 %vm85_vm0, %v704_v17 }
0x1d1a   :  { %v1295_v5 = vpop.permute.xlu0 %1294 }
0x1d1b   :  { %v1297_v10 = vmul.f32 %v1295_v5, %v1278_v14  ;;  %v994_v5 = vsel %vm840_vm1, %v2012_v58, -inf }
0x1d1d   :  { %1312 = vrot.lane.b32.xlu2 %v1297_v10, %s1711_s17  ;;  %v1298_v32 = vsel %vm840_vm1, %v1297_v10, -inf  ;;  %v995_v10 = vrot.slane %v994_v5, 4 }
0x1d1e   :  { %v1299_v34 = vrot.slane %v1298_v32, 4 }
0x1d1f   :  { %v996_v7 = vmax.f32 %v994_v5, %v995_v10 }
0x1d20   :  { %v1300_v36 = vmax.f32 %v1298_v32, %v1299_v34 }
0x1d21   :  { %v997_v22 = vrot.slane %v996_v7, 2 }
0x1d22   :  { %v1301_v23 = vrot.slane %v1300_v36, 2 }
0x1d23   :  { %v998_v62 = vmax.f32 %v996_v7, %v997_v22 }
0x1d24   :  { %v1302_v39 = vmax.f32 %v1300_v36, %v1301_v23 }
0x1d25   :  { %v999_v28 = vrot.slane %v998_v62, 1 }
0x1d26   :  { %v1303_v41 = vrot.slane %v1302_v39, 1 }
0x1d28   :  { %v1304_v42 = vmax.f32 %v1302_v39, %v1303_v41 }
0x1d32   :  { %v770_v20 = vpop.f32.mrf.mxu3 }
0x1d33   :  { %v771_v21 = vadd.f32 %v1959_v15, %v770_v20  ;;  %v1074_v15 = vmax.f32 %v1072_v30, %v1073_v57  ;;  %v1222_v20 = vsel %vm840_vm1, %v2051_v33, -inf }
0x1d35   :  { %v1075_v38 = vrot.slane %v1074_v15, 1 }
0x1d37   :  { %v1076_v40 = vmax.f32 %v1074_v15, %v1075_v38 }
0x1d77   :  { %v1313_v18 = vpop.permute.xlu2 %1312 }
0x1d78   :  { %1482 = vmatmul.msk.f32.vlgmr.msrb.gmra.mxu2 %vm85_vm0, %v1313_v18 }
0x1dfb   :  { %v1333_v24 = vpop.f32.mrf.mxu2 }
0x1dfc   :  { %v1336_v25 = vadd.f32 %v1333_v24, %v771_v21  ;;  %v1223_v24 = vrot.slane %v1222_v20, 4 }
0x1dfe   :  { %1616 = vtanh.f32 %v1336_v25  ;;  %v1483_v43 = vmul.f32 -1.442695, %v1336_v25  ;;  %v1224_v25 = vmax.f32 %v1222_v20, %v1223_v24 }
0x1e00   :  { %1618 = vpow2.f32 %v1483_v43  ;;  %v1225_v58 = vrot.slane %v1224_v25, 2  ;;  %v1390_v43 = vld [vmem:[#allocation8 + $0x10] sm:$0xff] }
0x1e04   :  { %v1617_v31 = vpop.eup %1616 }
0x1e05   :  { %1359 = vrot.lane.b32.xlu0 %v1617_v31, %s1710_s16  ;;  %v1000_v31 = vmax.f32 %v998_v62, %v999_v28 }
0x1e06   :  { %v1619_v44 = vpop.eup %1618 }
0x1e07   :  { %v1340_v45 = vadd.f32 1.0, %v1619_v44  ;;  %v1389_v44 = vld [vmem:[#allocation8 + $0x8] sm:$0xff] }
0x1e09   :  { %1620 = vrcp.f32 %v1340_v45  ;;  %v1352_v59 = vand.u32 2147483648, %v1340_v45  ;;  %vm1346_vm3 = vweird.f32 %v1340_v45  ;;  %v1350_v60 = vand.u32 2147483647, %v1340_v45 }
0x1e0b   :  { %v1353_v8 = vor.u32 1.1754944e-38, %v1352_v59  ;;  %vm1351_vm5 = vcmp.eq.f32.partialorder %v1350_v60, 8.507059e+37 }
0x1e0d   :  { %849 = vrot.lane.b32.xlu0 %v847_v37, %s1711_s17 }
0x1e0f   :  { %v1621_v46 = vpop.eup %1620 }
0x1e10   :  { %v1342_v47 = vmul.f32 %v1621_v46, %v1340_v45  ;;  %vm1347_vm2 = vweird.f32 %v1621_v46  ;;  %v1388_v45 = vld [vmem:[#allocation8] sm:$0xff] }
0x1e11   :  { %vm1348_vm4 = vmor %vm1346_vm3, %vm1347_vm2 }
0x1e12   :  { %v1343_v49 = vsub.f32 1.0, %v1342_v47 }
0x1e14   :  { %v1344_v53 = vmul.f32 %v1621_v46, %v1343_v49 }
0x1e15   :  { %1078 = vrot.lane.b32.xlu0 %v1076_v40, %s1711_s17 }
0x1e16   :  { %v1345_v55 = vadd.f32 %v1621_v46, %v1344_v53 }
0x1e18   :  { %v1349_v48 = vsel %vm1348_vm4, %v1621_v46, %v1345_v55 }
0x1e19   :  { %v1354_v12 = vsel %vm1351_vm5, %v1353_v8, %v1349_v48 }
0x1e1a   :  { %v1357_v18 = vmul.f32 %v1354_v12, %v2064_v4  ;;  %v1226_v4 = vmax.f32 %v1224_v25, %v1225_v58 }
0x1e1c   :  { %v1227_v33 = vrot.slane %v1226_v4, 1 }
0x1e1d   :  { %1306 = vrot.lane.b32.xlu0 %v1304_v42, %s1711_s17  ;;  %v1391_v42 = vld [vmem:[#allocation8 + $0x18] sm:$0xff] }
0x1e1e   :  { %v1228_v32 = vmax.f32 %v1226_v4, %v1227_v33  ;;  %1411 = vmatpush.msrb.mxu1 %v1391_v42 }
0x1e20   :  { %1412 = vmatpush.msrb.mxu1 %v1390_v43 }
0x1e22   :  { %1413 = vmatpush.msrb.mxu1 %v1389_v44 }
0x1e24   :  { %1414 = vmatpush.msrb.mxu1 %v1388_v45 }
0x1e77   :  { %v1360_v11 = vpop.permute.xlu0 %1359 }
0x1e78   :  { %v1362_v14 = vmul.f32 %v1360_v11, %v1354_v12 }
0x1e7a   :  { %1364 = vrot.lane.b32.xlu1 %v1362_v14, %s1711_s17 }
0x1e7f   :  { %v850_v52 = vpop.permute.xlu0 %849 }
0x1e80   :  { %853 = vst.msk [vmem:[#allocation4] sm:$0x1] %vm852_vm6, %v850_v52 }
0x1e82   :  { %926 = vrot.lane.b32.xlu1 %v924_v1, %s1711_s17 }
0x1e87   :  { %v1079_v2 = vpop.permute.xlu0 %1078 }
0x1e88   :  { %1081 = vst.msk [vmem:[#allocation4 + $0x3] sm:$0x1] %vm852_vm6, %v1079_v2 }
0x1e8a   :  { %1154 = vrot.lane.b32.xlu1 %v1152_v3, %s1711_s17 }
0x1e8f   :  { %v1307_v17 = vpop.permute.xlu0 %1306 }
0x1e90   :  { %1309 = vst.msk [vmem:[#allocation4 + $0x6] sm:$0x1] %vm852_vm6, %v1307_v17 }
0x1eec   :  { %v1365_v19 = vpop.permute.xlu1 %1364 }
0x1eed   :  { %v1367_v21 = vadd.f32 %v1365_v19, %v1357_v18 }
0x1eef   :  { %1622 = vtanh.f32 %v1367_v21 }
0x1ef4   :  { %v927_v26 = vpop.permute.xlu1 %926 }
0x1ef5   :  { %v1623_v27 = vpop.eup %1622  ;;  %929 = vst.msk [vmem:[#allocation4 + $0x1] sm:$0x1] %vm852_vm6, %v927_v26 }
0x1ef6   :  { %1370 = vrot.lane.b32.xlu2 %v1623_v27, %s1710_s16 }
0x1efc   :  { %v1155_v30 = vpop.permute.xlu1 %1154 }
0x1efd   :  { %1157 = vst.msk [vmem:[#allocation4 + $0x4] sm:$0x1] %vm852_vm6, %v1155_v30 }
0x1efe   :  { %1002 = vrot.lane.b32.xlu2 %v1000_v31, %s1711_s17 }
0x1f06   :  { %1230 = vrot.lane.b32.xlu2 %v1228_v32, %s1711_s17 }
0x1f50   :  { %v1371_v57 = vpop.permute.xlu2 %1370 }
0x1f51   :  { %v1373_v34 = vmul.f32 %v1371_v57, %v1354_v12 }
0x1f53   :  { %v1374_v35 = vsel %vm840_vm1, %v1373_v34, -inf }
0x1f54   :  { %v1375_v15 = vrot.slane %v1374_v35, 4 }
0x1f56   :  { %v1376_v36 = vmax.f32 %v1374_v35, %v1375_v15 }
0x1f58   :  { %v1377_v37 = vrot.slane %v1376_v36, 2  ;;  %v1003_v23 = vpop.permute.xlu2 %1002 }
0x1f59   :  { %1005 = vst.msk [vmem:[#allocation4 + $0x2] sm:$0x1] %vm852_vm6, %v1003_v23 }
0x1f5a   :  { %v1378_v38 = vmax.f32 %v1376_v36, %v1377_v37 }
0x1f5c   :  { %v1379_v39 = vrot.slane %v1378_v38, 1 }
0x1f5e   :  { %v1380_v40 = vmax.f32 %v1378_v38, %v1379_v39 }
0x1f60   :  { %v1231_v41 = vpop.permute.xlu2 %1230  ;;  %1382 = vrot.lane.b32.xlu1 %v1380_v40, %s1711_s17  ;;  %s1712_s17 = smov [#allocation10]  }
0x1f61   :  { %1233 = vst.msk [vmem:[#allocation4 + $0x5] sm:$0x1] %vm852_vm6, %v1231_v41  ;;  %s1425_s18 = sshll.u32 %s1712_s17, 4  ;;  %s1426_s18 = int_to_ptr.vmem [resolvable:$true] %s1425_s18 }
0x1fd2   :  { %v1383_v46 = vpop.permute.xlu1 %1382 }
0x1fd3   :  { %1385 = vst.msk [vmem:[#allocation4 + $0x7] sm:$0x1] %vm852_vm6, %v1383_v46 }
0x1fda   :  { %v1386_v47 = vld [vmem:[#allocation4] sm:$0xff] }
0x1fdb   :  { %1624 = vtanh.f32 %v1386_v47 }
0x1fe1   :  { %v1625_v49 = vpop.eup %1624 }
0x1fe2   :  { %1484 = vmatmul.msk.f32.vlgmr.msrb.gmra.mxu1 %vm85_vm0, %v1625_v49 }
0x205f   :  { %v1416_v51 = vpop.f32.mrf.mxu1 }
0x2060   :  { %v1417_v53 = vadd.f32 %v1495_v50, %v1416_v51 }
0x2062   :  { %1419 = vst [vmem:[#allocation10] sm:$0xff] %v1417_v53 }
0x2063   :  { %1430 = dma.vmem_to_hbm [thread:$0]  %s1426_s18, 128, %s1428_s5, [#allocation7]  }
0x2064   :  { %1703 = dma.done.wait [#allocation7], 128  }
0x2065   :  { %1704 = vsyncadd [#allocation7], 4294967168 }
0x2066   :  { %1435 = vsyncpa [#allocation6], 1 }
0x2067   :  { %1436 = vsyncpa [#allocation9], 1 }
0x2068   :  { %1437 = vsyncpa [#allocation7], 1 }

</bundles_post_ra>
